<compile_context>
chip_gen: v5e
topology: v5e:2x2
jax: 0.10.0
libtpu: 0.0.40
codegen_flags: <defaults>
</compile_context>

<pallas_src>
import functools

import jax
import jax.numpy as jnp
import numpy as np
from jax import lax
from jax.experimental import pallas as pl
from jax.experimental.pallas import tpu as pltpu

GATES = ("f", "i", "o", "c")  # gate order along the fused lane axis


def _round_up(x, m):
    return ((x + m - 1) // m) * m


def _lstm_kernel(x_ref, w_ref, b_ref, u_ref, h0_ref, c0_ref,
                 out_ref, hn_ref, cn_ref,
                 prex_s, h_s, c_s,
                 *, t_blk, bp, seq_len, hp, need_mask):
    """One grid step == one block of t_blk timesteps (sequential time axis).

    Refs (VMEM views):
      x_ref:   (t_blk*Bp, I)        input slab for this time block (flattened)
      w_ref:   (I, 4*HP)            fused input-projection weights (resident)
      b_ref:   (1, 4*HP)            fused biases (resident)
      u_ref:   (HP, 4*HP)           fused block-diagonal recurrent weights
      h0_ref:  (Bp, HP)             initial hidden state (layers on lanes)
      c0_ref:  (Bp, HP)             initial cell state
      out_ref: (t_blk*Bp, HP)       per-timestep hidden state (all layers;
                                     last layer sliced out in the wrapper)
      hn_ref, cn_ref: (Bp, HP)      final states (written at last grid step)
      prex_s:  VMEM (t_blk*Bp, 4*HP) f32  precomputed input projections
      h_s, c_s: VMEM (Bp, HP) f32          state carried across grid steps
    """
    tb = pl.program_id(0)

    @pl.when(tb == 0)
    def _():
        h_s[...] = h0_ref[...].astype(jnp.float32)
        c_s[...] = c0_ref[...].astype(jnp.float32)

    # ---- Phase 1 (off the recurrent critical path): input projection for the
    # whole time block as ONE wide GEMM, bias folded in.
    prex_s[...] = jnp.dot(x_ref[...].astype(jnp.float32), w_ref[...],
                          preferred_element_type=jnp.float32) + b_ref[...]

    # ---- Phase 2: sequential recurrence.  Only one fused h @ U matmul (all
    # gates, all layers) plus elementwise gate math per timestep.
    def step(tt, carry):
        row = pl.multiple_of(tt * bp, bp)
        h_prev = h_s[...]
        c_prev = c_s[...]
        gates = prex_s[pl.ds(row, bp), :] + jnp.dot(
            h_prev, u_ref[...], preferred_element_type=jnp.float32)
        f = jax.nn.sigmoid(gates[:, 0 * hp:1 * hp])
        i = jax.nn.sigmoid(gates[:, 1 * hp:2 * hp])
        o = jax.nn.sigmoid(gates[:, 2 * hp:3 * hp])
        g = jnp.tanh(gates[:, 3 * hp:4 * hp])
        c_new = f * c_prev + i * g
        h_new = o * jnp.tanh(c_new)
        if need_mask:  # static flag: freeze state on padded timesteps
            valid = (tb * t_blk + tt) < seq_len
            c_new = jnp.where(valid, c_new, c_prev)
            h_new = jnp.where(valid, h_new, h_prev)
        c_s[...] = c_new
        h_s[...] = h_new
        out_ref[pl.ds(row, bp), :] = h_new.astype(out_ref.dtype)
        return carry

    lax.fori_loop(0, t_blk, step, 0, unroll=bool(t_blk <= 16))

    @pl.when(tb == pl.num_programs(0) - 1)
    def _():
        hn_ref[...] = h_s[...].astype(hn_ref.dtype)
        cn_ref[...] = c_s[...].astype(cn_ref.dtype)


def lstm_forward(x, W, U, b, h0=None, c0=None, *, t_blk=None):
    """x: (S,B,I); W[g]: (L,H,I); U[g]: (L,H,H); b[g]: (L,H); h0,c0: (L,B,H).

    Returns (output (S,B,H), (h_n, c_n) each (L,B,H)) — same as the module.
    """
    S, B, I = x.shape
    L, H, _ = W["f"].shape
    if h0 is None:
        h0 = jnp.zeros((L, B, H), x.dtype)
    if c0 is None:
        c0 = jnp.zeros((L, B, H), x.dtype)

    LH = L * H
    HP = _round_up(LH, 128)   # lane-dense per-gate block (multiple of 128)
    Bp = _round_up(B, 8)      # sublane-dense batch

    if t_blk is None:
        t_blk = S if S <= 32 else 32
    t_blk = max(1, min(t_blk, S))
    S_pad = pl.cdiv(S, t_blk) * t_blk
    need_mask = S_pad != S

    f32 = jnp.float32

    # ---- Fused parameter layout (built once in the wrapper).
    # Column layout is gate-major, layer-minor:  col = gate*HP + layer*H + j.
    w_cols, b_cols, u_cols = [], [], []
    for g in GATES:
        wg = jnp.transpose(W[g].astype(f32), (2, 0, 1)).reshape(I, LH)  # (I,LH)
        w_cols.append(jnp.pad(wg, ((0, 0), (0, HP - LH))))
        bg = b[g].astype(f32).reshape(LH)
        b_cols.append(jnp.pad(bg, (0, HP - LH)))
        ug = jnp.zeros((LH, LH), f32)            # block-diagonal over layers
        for l in range(L):
            ug = ug.at[l * H:(l + 1) * H, l * H:(l + 1) * H].set(
                U[g][l].astype(f32).T)
        u_cols.append(jnp.pad(ug, ((0, HP - LH), (0, HP - LH))))
    W_big = jnp.concatenate(w_cols, axis=1)                       # (I, 4*HP)
    b_big = jnp.concatenate(b_cols, axis=0).reshape(1, 4 * HP)    # (1, 4*HP)
    U_big = jnp.concatenate(u_cols, axis=1)                       # (HP, 4*HP)

    # ---- Padded activations (flattened (time*batch) rows), flattened states
    # (layers along lanes).
    x_p = jnp.pad(x.astype(f32),
                  ((0, S_pad - S), (0, Bp - B), (0, 0))).reshape(S_pad * Bp, I)
    h0_f = jnp.pad(jnp.transpose(h0.astype(f32), (1, 0, 2)).reshape(B, LH),
                   ((0, Bp - B), (0, HP - LH)))
    c0_f = jnp.pad(jnp.transpose(c0.astype(f32), (1, 0, 2)).reshape(B, LH),
                   ((0, Bp - B), (0, HP - LH)))

    kernel = functools.partial(_lstm_kernel, t_blk=t_blk, bp=Bp, seq_len=S,
                               hp=HP, need_mask=need_mask)

    out_p, hn_f, cn_f = pl.pallas_call(
        kernel,
        out_shape=(
            jax.ShapeDtypeStruct((S_pad * Bp, HP), f32),
            jax.ShapeDtypeStruct((Bp, HP), f32),
            jax.ShapeDtypeStruct((Bp, HP), f32),
        ),
        grid_spec=pltpu.PrefetchScalarGridSpec(
            num_scalar_prefetch=0,
            grid=(S_pad // t_blk,),
            in_specs=[
                pl.BlockSpec((t_blk * Bp, I), lambda tb: (tb, 0)),   # x slab
                pl.BlockSpec((I, 4 * HP), lambda tb: (0, 0)),        # W_big
                pl.BlockSpec((1, 4 * HP), lambda tb: (0, 0)),        # b_big
                pl.BlockSpec((HP, 4 * HP), lambda tb: (0, 0)),       # U_big
                pl.BlockSpec((Bp, HP), lambda tb: (0, 0)),           # h0
                pl.BlockSpec((Bp, HP), lambda tb: (0, 0)),           # c0
            ],
            out_specs=[
                pl.BlockSpec((t_blk * Bp, HP), lambda tb: (tb, 0)),  # output
                pl.BlockSpec((Bp, HP), lambda tb: (0, 0)),           # h_n
                pl.BlockSpec((Bp, HP), lambda tb: (0, 0)),           # c_n
            ],
            scratch_shapes=[
                pltpu.VMEM((t_blk * Bp, 4 * HP), jnp.float32),  # pre-activations
                pltpu.VMEM((Bp, HP), jnp.float32),              # h state
                pltpu.VMEM((Bp, HP), jnp.float32),              # c state
            ],
        ),
        compiler_params=pltpu.CompilerParams(
            dimension_semantics=("arbitrary",),   # time recurrence is sequential
        ),
    )(x_p, W_big, b_big, U_big, h0_f, c0_f)

    out_p = out_p.reshape(S_pad, Bp, HP)
    out = out_p[:S, :B, (L - 1) * H: L * H].astype(x.dtype)
    hn = hn_f[:B, :LH].reshape(B, L, H).transpose(1, 0, 2).astype(x.dtype)
    cn = cn_f[:B, :LH].reshape(B, L, H).transpose(1, 0, 2).astype(x.dtype)
    return out, (hn, cn)


def lstm_reference(x, W, U, b, h0, c0):
    """Pure-JAX reference mirroring the PyTorch forward loop exactly."""
    S = x.shape[0]
    L = h0.shape[0]
    h, c = h0, c0
    outs = []
    for t in range(S):
        hs, cs = [], []
        for l in range(L):
            f = jax.nn.sigmoid(x[t] @ W["f"][l].T + h[l] @ U["f"][l].T + b["f"][l])
            i = jax.nn.sigmoid(x[t] @ W["i"][l].T + h[l] @ U["i"][l].T + b["i"][l])
            o = jax.nn.sigmoid(x[t] @ W["o"][l].T + h[l] @ U["o"][l].T + b["o"][l])
            g = jnp.tanh(x[t] @ W["c"][l].T + h[l] @ U["c"][l].T + b["c"][l])
            c_new = f * c[l] + i * g
            cs.append(c_new)
            hs.append(o * jnp.tanh(c_new))
        h = jnp.stack(hs, axis=0)
        c = jnp.stack(cs, axis=0)
        outs.append(h[-1])
    return jnp.stack(outs, axis=0), (h, c)


if __name__ == "__main__":
    # Shapes from the module's LSTM.main(): LSTM(10, 20, 2), x (5, 3, 10).
    seq_len, batch, input_size, hidden_size, num_layers = 5, 3, 10, 20, 2

    key = jax.random.PRNGKey(0)
    k_x, k_h0, k_c0, *k_params = jax.random.split(key, 3 + 12)

    # PyTorch init: uniform(-sqrt(1/hidden), sqrt(1/hidden)) per parameter.
    bound = float(np.sqrt(1.0 / hidden_size))
    W, U, b = {}, {}, {}
    for gi, g in enumerate(GATES):
        W[g] = jax.random.uniform(k_params[3 * gi + 0],
                                  (num_layers, hidden_size, input_size),
                                  jnp.float32, -bound, bound)
        U[g] = jax.random.uniform(k_params[3 * gi + 1],
                                  (num_layers, hidden_size, hidden_size),
                                  jnp.float32, -bound, bound)
        b[g] = jax.random.uniform(k_params[3 * gi + 2],
                                  (num_layers, hidden_size),
                                  jnp.float32, -bound, bound)

    x = jax.random.normal(k_x, (seq_len, batch, input_size), jnp.float32)
    h0 = jax.random.normal(k_h0, (num_layers, batch, hidden_size), jnp.float32)
    c0 = jax.random.normal(k_c0, (num_layers, batch, hidden_size), jnp.float32)

    out, (hn, cn) = lstm_forward(x, W, U, b, h0, c0)
    out, hn, cn = jax.block_until_ready((out, hn, cn))

    out_r, (hn_r, cn_r) = lstm_reference(x, W, U, b, h0, c0)
    np.testing.assert_allclose(np.asarray(out), np.asarray(out_r),
                               rtol=1e-5, atol=1e-5)
    np.testing.assert_allclose(np.asarray(hn), np.asarray(hn_r),
                               rtol=1e-5, atol=1e-5)
    np.testing.assert_allclose(np.asarray(cn), np.asarray(cn_r),
                               rtol=1e-5, atol=1e-5)

    print("KERNEL_OK")
</pallas_src>

<mosaic_0001>
module attributes {stable_mosaic.version = 11 : i64} {
  func.func @_lstm_kernel(%arg0: i32, %arg1: memref<40x10xf32, #tpu.memory_space<vmem>>, %arg2: memref<10x512xf32, #tpu.memory_space<vmem>>, %arg3: memref<1x512xf32, #tpu.memory_space<vmem>>, %arg4: memref<128x512xf32, #tpu.memory_space<vmem>>, %arg5: memref<8x128xf32, #tpu.memory_space<vmem>>, %arg6: memref<8x128xf32, #tpu.memory_space<vmem>>, %arg7: memref<40x128xf32, #tpu.memory_space<vmem>>, %arg8: memref<8x128xf32, #tpu.memory_space<vmem>>, %arg9: memref<8x128xf32, #tpu.memory_space<vmem>>, %arg10: memref<40x512xf32, #tpu.memory_space<vmem>>, %arg11: memref<8x128xf32, #tpu.memory_space<vmem>>, %arg12: memref<8x128xf32, #tpu.memory_space<vmem>>) attributes {dimension_semantics = [#tpu.dimension_semantics<arbitrary>], iteration_bounds = array<i64: 1>, scalar_prefetch = 0 : i64, scratch_operands = 3 : i64, tpu.core_type = #tpu.core_type<tc>, window_params = [{transform_indices = @transform_0, window_bounds = array<i64: 40, 10>}, {pipeline_mode = #tpu.pipeline_mode<synchronous>, transform_indices = @transform_1, window_bounds = array<i64: 10, 512>}, {pipeline_mode = #tpu.pipeline_mode<synchronous>, transform_indices = @transform_2, window_bounds = array<i64: 1, 512>}, {pipeline_mode = #tpu.pipeline_mode<synchronous>, transform_indices = @transform_3, window_bounds = array<i64: 128, 512>}, {pipeline_mode = #tpu.pipeline_mode<synchronous>, transform_indices = @transform_4, window_bounds = array<i64: 8, 128>}, {pipeline_mode = #tpu.pipeline_mode<synchronous>, transform_indices = @transform_5, window_bounds = array<i64: 8, 128>}, {transform_indices = @transform_6, window_bounds = array<i64: 40, 128>}, {pipeline_mode = #tpu.pipeline_mode<synchronous>, transform_indices = @transform_7, window_bounds = array<i64: 8, 128>}, {pipeline_mode = #tpu.pipeline_mode<synchronous>, transform_indices = @transform_8, window_bounds = array<i64: 8, 128>}]} {
    %c0_i32 = arith.constant 0 : i32
    %0 = arith.cmpi eq, %arg0, %c0_i32 : i32
    %1 = arith.extui %0 : i1 to i32
    %c0_i32_0 = arith.constant 0 : i32
    %2 = arith.cmpi ne, %1, %c0_i32_0 : i32
    scf.if %2 {
      %c0_95 = arith.constant 0 : index
      %c0_96 = arith.constant 0 : index
      %203 = vector.load %arg5[%c0_95, %c0_96] : memref<8x128xf32, #tpu.memory_space<vmem>>, vector<8x128xf32>
      %c0_97 = arith.constant 0 : index
      %c0_98 = arith.constant 0 : index
      %204 = vector.load %arg11[%c0_97, %c0_98] : memref<8x128xf32, #tpu.memory_space<vmem>>, vector<8x128xf32>
      tpu.vector_store %arg11[%c0_97, %c0_98], %203 {strides = array<i32>} : memref<8x128xf32, #tpu.memory_space<vmem>>, vector<8x128xf32>,
      %c0_99 = arith.constant 0 : index
      %c0_100 = arith.constant 0 : index
      %205 = vector.load %arg6[%c0_99, %c0_100] : memref<8x128xf32, #tpu.memory_space<vmem>>, vector<8x128xf32>
      %c0_101 = arith.constant 0 : index
      %c0_102 = arith.constant 0 : index
      %206 = vector.load %arg12[%c0_101, %c0_102] : memref<8x128xf32, #tpu.memory_space<vmem>>, vector<8x128xf32>
      tpu.vector_store %arg12[%c0_101, %c0_102], %205 {strides = array<i32>} : memref<8x128xf32, #tpu.memory_space<vmem>>, vector<8x128xf32>,
    } else {
    }
    %c0 = arith.constant 0 : index
    %c0_1 = arith.constant 0 : index
    %3 = vector.load %arg1[%c0, %c0_1] : memref<40x10xf32, #tpu.memory_space<vmem>>, vector<40x10xf32>
    %c0_2 = arith.constant 0 : index
    %c0_3 = arith.constant 0 : index
    %4 = vector.load %arg2[%c0_2, %c0_3] : memref<10x512xf32, #tpu.memory_space<vmem>>, vector<10x512xf32>
    %cst = arith.constant dense<0.000000e+00> : vector<40x512xf32>
    %5 = tpu.matmul %3, %4, %cst {dimension_numbers = #tpu.dot_dimension_numbers<[1], [0], [0], [1], [0, 0, 1, 1], [], []>} : vector<40x10xf32>, vector<10x512xf32>, vector<40x512xf32> -> vector<40x512xf32>
    %c0_4 = arith.constant 0 : index
    %c0_5 = arith.constant 0 : index
    %6 = vector.load %arg3[%c0_4, %c0_5] : memref<1x512xf32, #tpu.memory_space<vmem>>, vector<1x512xf32>
    %7 = vector.broadcast %6 : vector<1x512xf32> to vector<40x512xf32>
    %8 = arith.addf %5, %7 : vector<40x512xf32>
    %c0_6 = arith.constant 0 : index
    %c0_7 = arith.constant 0 : index
    %9 = vector.load %arg10[%c0_6, %c0_7] : memref<40x512xf32, #tpu.memory_space<vmem>>, vector<40x512xf32>
    tpu.vector_store %arg10[%c0_6, %c0_7], %8 {strides = array<i32>} : memref<40x512xf32, #tpu.memory_space<vmem>>, vector<40x512xf32>,
    %c0_i32_8 = arith.constant 0 : i32
    %c8_i32 = arith.constant 8 : i32
    %10 = arith.muli %c0_i32_8, %c8_i32 : i32
    %11 = tpu.assume_multiple %10, 8 : i32
    %c0_9 = arith.constant 0 : index
    %c0_10 = arith.constant 0 : index
    %12 = vector.load %arg11[%c0_9, %c0_10] : memref<8x128xf32, #tpu.memory_space<vmem>>, vector<8x128xf32>
    %c0_11 = arith.constant 0 : index
    %c0_12 = arith.constant 0 : index
    %13 = vector.load %arg12[%c0_11, %c0_12] : memref<8x128xf32, #tpu.memory_space<vmem>>, vector<8x128xf32>
    %14 = arith.index_cast %11 : i32 to index
    %c0_13 = arith.constant 0 : index
    %15 = vector.load %arg10[%14, %c0_13] : memref<40x512xf32, #tpu.memory_space<vmem>>, vector<8x512xf32>
    %c0_14 = arith.constant 0 : index
    %c0_15 = arith.constant 0 : index
    %16 = vector.load %arg4[%c0_14, %c0_15] : memref<128x512xf32, #tpu.memory_space<vmem>>, vector<128x512xf32>
    %cst_16 = arith.constant dense<0.000000e+00> : vector<8x512xf32>
    %17 = tpu.matmul %12, %16, %cst_16 {dimension_numbers = #tpu.dot_dimension_numbers<[1], [0], [0], [1], [0, 0, 1, 1], [], []>} : vector<8x128xf32>, vector<128x512xf32>, vector<8x512xf32> -> vector<8x512xf32>
    %18 = arith.addf %15, %17 : vector<8x512xf32>
    %19 = vector.extract_strided_slice %18 {offsets = [0, 0], sizes = [8, 128], strides = [1, 1]} : vector<8x512xf32> to vector<8x128xf32>
    %20 = arith.negf %19 : vector<8x128xf32>
    %21 = math.exp %20 : vector<8x128xf32>
    %cst_17 = arith.constant 1.000000e+00 : f32
    %22 = vector.broadcast %cst_17 : f32 to vector<8x128xf32>
    %23 = arith.addf %22, %21 : vector<8x128xf32>
    %24 = arith.divf %22, %23 : vector<8x128xf32>
    %25 = vector.extract_strided_slice %18 {offsets = [0, 128], sizes = [8, 128], strides = [1, 1]} : vector<8x512xf32> to vector<8x128xf32>
    %26 = arith.negf %25 : vector<8x128xf32>
    %27 = math.exp %26 : vector<8x128xf32>
    %cst_18 = arith.constant 1.000000e+00 : f32
    %28 = vector.broadcast %cst_18 : f32 to vector<8x128xf32>
    %29 = arith.addf %28, %27 : vector<8x128xf32>
    %30 = arith.divf %28, %29 : vector<8x128xf32>
    %31 = vector.extract_strided_slice %18 {offsets = [0, 256], sizes = [8, 128], strides = [1, 1]} : vector<8x512xf32> to vector<8x128xf32>
    %32 = arith.negf %31 : vector<8x128xf32>
    %33 = math.exp %32 : vector<8x128xf32>
    %cst_19 = arith.constant 1.000000e+00 : f32
    %34 = vector.broadcast %cst_19 : f32 to vector<8x128xf32>
    %35 = arith.addf %34, %33 : vector<8x128xf32>
    %36 = arith.divf %34, %35 : vector<8x128xf32>
    %37 = vector.extract_strided_slice %18 {offsets = [0, 384], sizes = [8, 128], strides = [1, 1]} : vector<8x512xf32> to vector<8x128xf32>
    %38 = math.tanh %37 : vector<8x128xf32>
    %39 = arith.mulf %24, %13 : vector<8x128xf32>
    %40 = arith.mulf %30, %38 : vector<8x128xf32>
    %41 = arith.addf %39, %40 : vector<8x128xf32>
    %42 = math.tanh %41 : vector<8x128xf32>
    %43 = arith.mulf %36, %42 : vector<8x128xf32>
    %c0_20 = arith.constant 0 : index
    %c0_21 = arith.constant 0 : index
    %44 = vector.load %arg12[%c0_20, %c0_21] : memref<8x128xf32, #tpu.memory_space<vmem>>, vector<8x128xf32>
    tpu.vector_store %arg12[%c0_20, %c0_21], %41 {strides = array<i32>} : memref<8x128xf32, #tpu.memory_space<vmem>>, vector<8x128xf32>,
    %c0_22 = arith.constant 0 : index
    %c0_23 = arith.constant 0 : index
    %45 = vector.load %arg11[%c0_22, %c0_23] : memref<8x128xf32, #tpu.memory_space<vmem>>, vector<8x128xf32>
    tpu.vector_store %arg11[%c0_22, %c0_23], %43 {strides = array<i32>} : memref<8x128xf32, #tpu.memory_space<vmem>>, vector<8x128xf32>,
    %46 = arith.index_cast %11 : i32 to index
    %c0_24 = arith.constant 0 : index
    %47 = vector.load %arg7[%46, %c0_24] : memref<40x128xf32, #tpu.memory_space<vmem>>, vector<8x128xf32>
    tpu.vector_store %arg7[%46, %c0_24], %43 {strides = array<i32>} : memref<40x128xf32, #tpu.memory_space<vmem>>, vector<8x128xf32>,
    %c1_i32 = arith.constant 1 : i32
    %c8_i32_25 = arith.constant 8 : i32
    %48 = arith.muli %c1_i32, %c8_i32_25 : i32
    %49 = tpu.assume_multiple %48, 8 : i32
    %c0_26 = arith.constant 0 : index
    %c0_27 = arith.constant 0 : index
    %50 = vector.load %arg11[%c0_26, %c0_27] : memref<8x128xf32, #tpu.memory_space<vmem>>, vector<8x128xf32>
    %c0_28 = arith.constant 0 : index
    %c0_29 = arith.constant 0 : index
    %51 = vector.load %arg12[%c0_28, %c0_29] : memref<8x128xf32, #tpu.memory_space<vmem>>, vector<8x128xf32>
    %52 = arith.index_cast %49 : i32 to index
    %c0_30 = arith.constant 0 : index
    %53 = vector.load %arg10[%52, %c0_30] : memref<40x512xf32, #tpu.memory_space<vmem>>, vector<8x512xf32>
    %c0_31 = arith.constant 0 : index
    %c0_32 = arith.constant 0 : index
    %54 = vector.load %arg4[%c0_31, %c0_32] : memref<128x512xf32, #tpu.memory_space<vmem>>, vector<128x512xf32>
    %cst_33 = arith.constant dense<0.000000e+00> : vector<8x512xf32>
    %55 = tpu.matmul %50, %54, %cst_33 {dimension_numbers = #tpu.dot_dimension_numbers<[1], [0], [0], [1], [0, 0, 1, 1], [], []>} : vector<8x128xf32>, vector<128x512xf32>, vector<8x512xf32> -> vector<8x512xf32>
    %56 = arith.addf %53, %55 : vector<8x512xf32>
    %57 = vector.extract_strided_slice %56 {offsets = [0, 0], sizes = [8, 128], strides = [1, 1]} : vector<8x512xf32> to vector<8x128xf32>
    %58 = arith.negf %57 : vector<8x128xf32>
    %59 = math.exp %58 : vector<8x128xf32>
    %cst_34 = arith.constant 1.000000e+00 : f32
    %60 = vector.broadcast %cst_34 : f32 to vector<8x128xf32>
    %61 = arith.addf %60, %59 : vector<8x128xf32>
    %62 = arith.divf %60, %61 : vector<8x128xf32>
    %63 = vector.extract_strided_slice %56 {offsets = [0, 128], sizes = [8, 128], strides = [1, 1]} : vector<8x512xf32> to vector<8x128xf32>
    %64 = arith.negf %63 : vector<8x128xf32>
    %65 = math.exp %64 : vector<8x128xf32>
    %cst_35 = arith.constant 1.000000e+00 : f32
    %66 = vector.broadcast %cst_35 : f32 to vector<8x128xf32>
    %67 = arith.addf %66, %65 : vector<8x128xf32>
    %68 = arith.divf %66, %67 : vector<8x128xf32>
    %69 = vector.extract_strided_slice %56 {offsets = [0, 256], sizes = [8, 128], strides = [1, 1]} : vector<8x512xf32> to vector<8x128xf32>
    %70 = arith.negf %69 : vector<8x128xf32>
    %71 = math.exp %70 : vector<8x128xf32>
    %cst_36 = arith.constant 1.000000e+00 : f32
    %72 = vector.broadcast %cst_36 : f32 to vector<8x128xf32>
    %73 = arith.addf %72, %71 : vector<8x128xf32>
    %74 = arith.divf %72, %73 : vector<8x128xf32>
    %75 = vector.extract_strided_slice %56 {offsets = [0, 384], sizes = [8, 128], strides = [1, 1]} : vector<8x512xf32> to vector<8x128xf32>
    %76 = math.tanh %75 : vector<8x128xf32>
    %77 = arith.mulf %62, %51 : vector<8x128xf32>
    %78 = arith.mulf %68, %76 : vector<8x128xf32>
    %79 = arith.addf %77, %78 : vector<8x128xf32>
    %80 = math.tanh %79 : vector<8x128xf32>
    %81 = arith.mulf %74, %80 : vector<8x128xf32>
    %c0_37 = arith.constant 0 : index
    %c0_38 = arith.constant 0 : index
    %82 = vector.load %arg12[%c0_37, %c0_38] : memref<8x128xf32, #tpu.memory_space<vmem>>, vector<8x128xf32>
    tpu.vector_store %arg12[%c0_37, %c0_38], %79 {strides = array<i32>} : memref<8x128xf32, #tpu.memory_space<vmem>>, vector<8x128xf32>,
    %c0_39 = arith.constant 0 : index
    %c0_40 = arith.constant 0 : index
    %83 = vector.load %arg11[%c0_39, %c0_40] : memref<8x128xf32, #tpu.memory_space<vmem>>, vector<8x128xf32>
    tpu.vector_store %arg11[%c0_39, %c0_40], %81 {strides = array<i32>} : memref<8x128xf32, #tpu.memory_space<vmem>>, vector<8x128xf32>,
    %84 = arith.index_cast %49 : i32 to index
    %c0_41 = arith.constant 0 : index
    %85 = vector.load %arg7[%84, %c0_41] : memref<40x128xf32, #tpu.memory_space<vmem>>, vector<8x128xf32>
    tpu.vector_store %arg7[%84, %c0_41], %81 {strides = array<i32>} : memref<40x128xf32, #tpu.memory_space<vmem>>, vector<8x128xf32>,
    %c2_i32 = arith.constant 2 : i32
    %c8_i32_42 = arith.constant 8 : i32
    %86 = arith.muli %c2_i32, %c8_i32_42 : i32
    %87 = tpu.assume_multiple %86, 8 : i32
    %c0_43 = arith.constant 0 : index
    %c0_44 = arith.constant 0 : index
    %88 = vector.load %arg11[%c0_43, %c0_44] : memref<8x128xf32, #tpu.memory_space<vmem>>, vector<8x128xf32>
    %c0_45 = arith.constant 0 : index
    %c0_46 = arith.constant 0 : index
    %89 = vector.load %arg12[%c0_45, %c0_46] : memref<8x128xf32, #tpu.memory_space<vmem>>, vector<8x128xf32>
    %90 = arith.index_cast %87 : i32 to index
    %c0_47 = arith.constant 0 : index
    %91 = vector.load %arg10[%90, %c0_47] : memref<40x512xf32, #tpu.memory_space<vmem>>, vector<8x512xf32>
    %c0_48 = arith.constant 0 : index
    %c0_49 = arith.constant 0 : index
    %92 = vector.load %arg4[%c0_48, %c0_49] : memref<128x512xf32, #tpu.memory_space<vmem>>, vector<128x512xf32>
    %cst_50 = arith.constant dense<0.000000e+00> : vector<8x512xf32>
    %93 = tpu.matmul %88, %92, %cst_50 {dimension_numbers = #tpu.dot_dimension_numbers<[1], [0], [0], [1], [0, 0, 1, 1], [], []>} : vector<8x128xf32>, vector<128x512xf32>, vector<8x512xf32> -> vector<8x512xf32>
    %94 = arith.addf %91, %93 : vector<8x512xf32>
    %95 = vector.extract_strided_slice %94 {offsets = [0, 0], sizes = [8, 128], strides = [1, 1]} : vector<8x512xf32> to vector<8x128xf32>
    %96 = arith.negf %95 : vector<8x128xf32>
    %97 = math.exp %96 : vector<8x128xf32>
    %cst_51 = arith.constant 1.000000e+00 : f32
    %98 = vector.broadcast %cst_51 : f32 to vector<8x128xf32>
    %99 = arith.addf %98, %97 : vector<8x128xf32>
    %100 = arith.divf %98, %99 : vector<8x128xf32>
    %101 = vector.extract_strided_slice %94 {offsets = [0, 128], sizes = [8, 128], strides = [1, 1]} : vector<8x512xf32> to vector<8x128xf32>
    %102 = arith.negf %101 : vector<8x128xf32>
    %103 = math.exp %102 : vector<8x128xf32>
    %cst_52 = arith.constant 1.000000e+00 : f32
    %104 = vector.broadcast %cst_52 : f32 to vector<8x128xf32>
    %105 = arith.addf %104, %103 : vector<8x128xf32>
    %106 = arith.divf %104, %105 : vector<8x128xf32>
    %107 = vector.extract_strided_slice %94 {offsets = [0, 256], sizes = [8, 128], strides = [1, 1]} : vector<8x512xf32> to vector<8x128xf32>
    %108 = arith.negf %107 : vector<8x128xf32>
    %109 = math.exp %108 : vector<8x128xf32>
    %cst_53 = arith.constant 1.000000e+00 : f32
    %110 = vector.broadcast %cst_53 : f32 to vector<8x128xf32>
    %111 = arith.addf %110, %109 : vector<8x128xf32>
    %112 = arith.divf %110, %111 : vector<8x128xf32>
    %113 = vector.extract_strided_slice %94 {offsets = [0, 384], sizes = [8, 128], strides = [1, 1]} : vector<8x512xf32> to vector<8x128xf32>
    %114 = math.tanh %113 : vector<8x128xf32>
    %115 = arith.mulf %100, %89 : vector<8x128xf32>
    %116 = arith.mulf %106, %114 : vector<8x128xf32>
    %117 = arith.addf %115, %116 : vector<8x128xf32>
    %118 = math.tanh %117 : vector<8x128xf32>
    %119 = arith.mulf %112, %118 : vector<8x128xf32>
    %c0_54 = arith.constant 0 : index
    %c0_55 = arith.constant 0 : index
    %120 = vector.load %arg12[%c0_54, %c0_55] : memref<8x128xf32, #tpu.memory_space<vmem>>, vector<8x128xf32>
    tpu.vector_store %arg12[%c0_54, %c0_55], %117 {strides = array<i32>} : memref<8x128xf32, #tpu.memory_space<vmem>>, vector<8x128xf32>,
    %c0_56 = arith.constant 0 : index
    %c0_57 = arith.constant 0 : index
    %121 = vector.load %arg11[%c0_56, %c0_57] : memref<8x128xf32, #tpu.memory_space<vmem>>, vector<8x128xf32>
    tpu.vector_store %arg11[%c0_56, %c0_57], %119 {strides = array<i32>} : memref<8x128xf32, #tpu.memory_space<vmem>>, vector<8x128xf32>,
    %122 = arith.index_cast %87 : i32 to index
    %c0_58 = arith.constant 0 : index
    %123 = vector.load %arg7[%122, %c0_58] : memref<40x128xf32, #tpu.memory_space<vmem>>, vector<8x128xf32>
    tpu.vector_store %arg7[%122, %c0_58], %119 {strides = array<i32>} : memref<40x128xf32, #tpu.memory_space<vmem>>, vector<8x128xf32>,
    %c3_i32 = arith.constant 3 : i32
    %c8_i32_59 = arith.constant 8 : i32
    %124 = arith.muli %c3_i32, %c8_i32_59 : i32
    %125 = tpu.assume_multiple %124, 8 : i32
    %c0_60 = arith.constant 0 : index
    %c0_61 = arith.constant 0 : index
    %126 = vector.load %arg11[%c0_60, %c0_61] : memref<8x128xf32, #tpu.memory_space<vmem>>, vector<8x128xf32>
    %c0_62 = arith.constant 0 : index
    %c0_63 = arith.constant 0 : index
    %127 = vector.load %arg12[%c0_62, %c0_63] : memref<8x128xf32, #tpu.memory_space<vmem>>, vector<8x128xf32>
    %128 = arith.index_cast %125 : i32 to index
    %c0_64 = arith.constant 0 : index
    %129 = vector.load %arg10[%128, %c0_64] : memref<40x512xf32, #tpu.memory_space<vmem>>, vector<8x512xf32>
    %c0_65 = arith.constant 0 : index
    %c0_66 = arith.constant 0 : index
    %130 = vector.load %arg4[%c0_65, %c0_66] : memref<128x512xf32, #tpu.memory_space<vmem>>, vector<128x512xf32>
    %cst_67 = arith.constant dense<0.000000e+00> : vector<8x512xf32>
    %131 = tpu.matmul %126, %130, %cst_67 {dimension_numbers = #tpu.dot_dimension_numbers<[1], [0], [0], [1], [0, 0, 1, 1], [], []>} : vector<8x128xf32>, vector<128x512xf32>, vector<8x512xf32> -> vector<8x512xf32>
    %132 = arith.addf %129, %131 : vector<8x512xf32>
    %133 = vector.extract_strided_slice %132 {offsets = [0, 0], sizes = [8, 128], strides = [1, 1]} : vector<8x512xf32> to vector<8x128xf32>
    %134 = arith.negf %133 : vector<8x128xf32>
    %135 = math.exp %134 : vector<8x128xf32>
    %cst_68 = arith.constant 1.000000e+00 : f32
    %136 = vector.broadcast %cst_68 : f32 to vector<8x128xf32>
    %137 = arith.addf %136, %135 : vector<8x128xf32>
    %138 = arith.divf %136, %137 : vector<8x128xf32>
    %139 = vector.extract_strided_slice %132 {offsets = [0, 128], sizes = [8, 128], strides = [1, 1]} : vector<8x512xf32> to vector<8x128xf32>
    %140 = arith.negf %139 : vector<8x128xf32>
    %141 = math.exp %140 : vector<8x128xf32>
    %cst_69 = arith.constant 1.000000e+00 : f32
    %142 = vector.broadcast %cst_69 : f32 to vector<8x128xf32>
    %143 = arith.addf %142, %141 : vector<8x128xf32>
    %144 = arith.divf %142, %143 : vector<8x128xf32>
    %145 = vector.extract_strided_slice %132 {offsets = [0, 256], sizes = [8, 128], strides = [1, 1]} : vector<8x512xf32> to vector<8x128xf32>
    %146 = arith.negf %145 : vector<8x128xf32>
    %147 = math.exp %146 : vector<8x128xf32>
    %cst_70 = arith.constant 1.000000e+00 : f32
    %148 = vector.broadcast %cst_70 : f32 to vector<8x128xf32>
    %149 = arith.addf %148, %147 : vector<8x128xf32>
    %150 = arith.divf %148, %149 : vector<8x128xf32>
    %151 = vector.extract_strided_slice %132 {offsets = [0, 384], sizes = [8, 128], strides = [1, 1]} : vector<8x512xf32> to vector<8x128xf32>
    %152 = math.tanh %151 : vector<8x128xf32>
    %153 = arith.mulf %138, %127 : vector<8x128xf32>
    %154 = arith.mulf %144, %152 : vector<8x128xf32>
    %155 = arith.addf %153, %154 : vector<8x128xf32>
    %156 = math.tanh %155 : vector<8x128xf32>
    %157 = arith.mulf %150, %156 : vector<8x128xf32>
    %c0_71 = arith.constant 0 : index
    %c0_72 = arith.constant 0 : index
    %158 = vector.load %arg12[%c0_71, %c0_72] : memref<8x128xf32, #tpu.memory_space<vmem>>, vector<8x128xf32>
    tpu.vector_store %arg12[%c0_71, %c0_72], %155 {strides = array<i32>} : memref<8x128xf32, #tpu.memory_space<vmem>>, vector<8x128xf32>,
    %c0_73 = arith.constant 0 : index
    %c0_74 = arith.constant 0 : index
    %159 = vector.load %arg11[%c0_73, %c0_74] : memref<8x128xf32, #tpu.memory_space<vmem>>, vector<8x128xf32>
    tpu.vector_store %arg11[%c0_73, %c0_74], %157 {strides = array<i32>} : memref<8x128xf32, #tpu.memory_space<vmem>>, vector<8x128xf32>,
    %160 = arith.index_cast %125 : i32 to index
    %c0_75 = arith.constant 0 : index
    %161 = vector.load %arg7[%160, %c0_75] : memref<40x128xf32, #tpu.memory_space<vmem>>, vector<8x128xf32>
    tpu.vector_store %arg7[%160, %c0_75], %157 {strides = array<i32>} : memref<40x128xf32, #tpu.memory_space<vmem>>, vector<8x128xf32>,
    %c4_i32 = arith.constant 4 : i32
    %c8_i32_76 = arith.constant 8 : i32
    %162 = arith.muli %c4_i32, %c8_i32_76 : i32
    %163 = tpu.assume_multiple %162, 8 : i32
    %c0_77 = arith.constant 0 : index
    %c0_78 = arith.constant 0 : index
    %164 = vector.load %arg11[%c0_77, %c0_78] : memref<8x128xf32, #tpu.memory_space<vmem>>, vector<8x128xf32>
    %c0_79 = arith.constant 0 : index
    %c0_80 = arith.constant 0 : index
    %165 = vector.load %arg12[%c0_79, %c0_80] : memref<8x128xf32, #tpu.memory_space<vmem>>, vector<8x128xf32>
    %166 = arith.index_cast %163 : i32 to index
    %c0_81 = arith.constant 0 : index
    %167 = vector.load %arg10[%166, %c0_81] : memref<40x512xf32, #tpu.memory_space<vmem>>, vector<8x512xf32>
    %c0_82 = arith.constant 0 : index
    %c0_83 = arith.constant 0 : index
    %168 = vector.load %arg4[%c0_82, %c0_83] : memref<128x512xf32, #tpu.memory_space<vmem>>, vector<128x512xf32>
    %cst_84 = arith.constant dense<0.000000e+00> : vector<8x512xf32>
    %169 = tpu.matmul %164, %168, %cst_84 {dimension_numbers = #tpu.dot_dimension_numbers<[1], [0], [0], [1], [0, 0, 1, 1], [], []>} : vector<8x128xf32>, vector<128x512xf32>, vector<8x512xf32> -> vector<8x512xf32>
    %170 = arith.addf %167, %169 : vector<8x512xf32>
    %171 = vector.extract_strided_slice %170 {offsets = [0, 0], sizes = [8, 128], strides = [1, 1]} : vector<8x512xf32> to vector<8x128xf32>
    %172 = arith.negf %171 : vector<8x128xf32>
    %173 = math.exp %172 : vector<8x128xf32>
    %cst_85 = arith.constant 1.000000e+00 : f32
    %174 = vector.broadcast %cst_85 : f32 to vector<8x128xf32>
    %175 = arith.addf %174, %173 : vector<8x128xf32>
    %176 = arith.divf %174, %175 : vector<8x128xf32>
    %177 = vector.extract_strided_slice %170 {offsets = [0, 128], sizes = [8, 128], strides = [1, 1]} : vector<8x512xf32> to vector<8x128xf32>
    %178 = arith.negf %177 : vector<8x128xf32>
    %179 = math.exp %178 : vector<8x128xf32>
    %cst_86 = arith.constant 1.000000e+00 : f32
    %180 = vector.broadcast %cst_86 : f32 to vector<8x128xf32>
    %181 = arith.addf %180, %179 : vector<8x128xf32>
    %182 = arith.divf %180, %181 : vector<8x128xf32>
    %183 = vector.extract_strided_slice %170 {offsets = [0, 256], sizes = [8, 128], strides = [1, 1]} : vector<8x512xf32> to vector<8x128xf32>
    %184 = arith.negf %183 : vector<8x128xf32>
    %185 = math.exp %184 : vector<8x128xf32>
    %cst_87 = arith.constant 1.000000e+00 : f32
    %186 = vector.broadcast %cst_87 : f32 to vector<8x128xf32>
    %187 = arith.addf %186, %185 : vector<8x128xf32>
    %188 = arith.divf %186, %187 : vector<8x128xf32>
    %189 = vector.extract_strided_slice %170 {offsets = [0, 384], sizes = [8, 128], strides = [1, 1]} : vector<8x512xf32> to vector<8x128xf32>
    %190 = math.tanh %189 : vector<8x128xf32>
    %191 = arith.mulf %176, %165 : vector<8x128xf32>
    %192 = arith.mulf %182, %190 : vector<8x128xf32>
    %193 = arith.addf %191, %192 : vector<8x128xf32>
    %194 = math.tanh %193 : vector<8x128xf32>
    %195 = arith.mulf %188, %194 : vector<8x128xf32>
    %c0_88 = arith.constant 0 : index
    %c0_89 = arith.constant 0 : index
    %196 = vector.load %arg12[%c0_88, %c0_89] : memref<8x128xf32, #tpu.memory_space<vmem>>, vector<8x128xf32>
    tpu.vector_store %arg12[%c0_88, %c0_89], %193 {strides = array<i32>} : memref<8x128xf32, #tpu.memory_space<vmem>>, vector<8x128xf32>,
    %c0_90 = arith.constant 0 : index
    %c0_91 = arith.constant 0 : index
    %197 = vector.load %arg11[%c0_90, %c0_91] : memref<8x128xf32, #tpu.memory_space<vmem>>, vector<8x128xf32>
    tpu.vector_store %arg11[%c0_90, %c0_91], %195 {strides = array<i32>} : memref<8x128xf32, #tpu.memory_space<vmem>>, vector<8x128xf32>,
    %198 = arith.index_cast %163 : i32 to index
    %c0_92 = arith.constant 0 : index
    %199 = vector.load %arg7[%198, %c0_92] : memref<40x128xf32, #tpu.memory_space<vmem>>, vector<8x128xf32>
    tpu.vector_store %arg7[%198, %c0_92], %195 {strides = array<i32>} : memref<40x128xf32, #tpu.memory_space<vmem>>, vector<8x128xf32>,
    %c5_i32 = arith.constant 5 : i32
    %c0_i32_93 = arith.constant 0 : i32
    %200 = arith.cmpi eq, %arg0, %c0_i32_93 : i32
    %201 = arith.extui %200 : i1 to i32
    %c0_i32_94 = arith.constant 0 : i32
    %202 = arith.cmpi ne, %201, %c0_i32_94 : i32
    scf.if %202 {
      %c0_95 = arith.constant 0 : index
      %c0_96 = arith.constant 0 : index
      %203 = vector.load %arg11[%c0_95, %c0_96] : memref<8x128xf32, #tpu.memory_space<vmem>>, vector<8x128xf32>
      %c0_97 = arith.constant 0 : index
      %c0_98 = arith.constant 0 : index
      %204 = vector.load %arg8[%c0_97, %c0_98] : memref<8x128xf32, #tpu.memory_space<vmem>>, vector<8x128xf32>
      tpu.vector_store %arg8[%c0_97, %c0_98], %203 {strides = array<i32>} : memref<8x128xf32, #tpu.memory_space<vmem>>, vector<8x128xf32>,
      %c0_99 = arith.constant 0 : index
      %c0_100 = arith.constant 0 : index
      %205 = vector.load %arg12[%c0_99, %c0_100] : memref<8x128xf32, #tpu.memory_space<vmem>>, vector<8x128xf32>
      %c0_101 = arith.constant 0 : index
      %c0_102 = arith.constant 0 : index
      %206 = vector.load %arg9[%c0_101, %c0_102] : memref<8x128xf32, #tpu.memory_space<vmem>>, vector<8x128xf32>
      tpu.vector_store %arg9[%c0_101, %c0_102], %205 {strides = array<i32>} : memref<8x128xf32, #tpu.memory_space<vmem>>, vector<8x128xf32>,
    } else {
    }
    return
  }
  func.func @transform_0(%arg0: i32) -> (i32, i32) {
    %c0_i32 = arith.constant 0 : i32
    %c0_i32_0 = arith.constant 0 : i32
    return %arg0, %c0_i32 : i32, i32
  }
  func.func @transform_1(%arg0: i32) -> (i32, i32) {
    %c0_i32 = arith.constant 0 : i32
    %c0_i32_0 = arith.constant 0 : i32
    %c0_i32_1 = arith.constant 0 : i32
    return %c0_i32, %c0_i32_0 : i32, i32
  }
  func.func @transform_2(%arg0: i32) -> (i32, i32) {
    %c0_i32 = arith.constant 0 : i32
    %c0_i32_0 = arith.constant 0 : i32
    %c0_i32_1 = arith.constant 0 : i32
    return %c0_i32, %c0_i32_0 : i32, i32
  }
  func.func @transform_3(%arg0: i32) -> (i32, i32) {
    %c0_i32 = arith.constant 0 : i32
    %c0_i32_0 = arith.constant 0 : i32
    %c0_i32_1 = arith.constant 0 : i32
    return %c0_i32, %c0_i32_0 : i32, i32
  }
  func.func @transform_4(%arg0: i32) -> (i32, i32) {
    %c0_i32 = arith.constant 0 : i32
    %c0_i32_0 = arith.constant 0 : i32
    %c0_i32_1 = arith.constant 0 : i32
    return %c0_i32, %c0_i32_0 : i32, i32
  }
  func.func @transform_5(%arg0: i32) -> (i32, i32) {
    %c0_i32 = arith.constant 0 : i32
    %c0_i32_0 = arith.constant 0 : i32
    %c0_i32_1 = arith.constant 0 : i32
    return %c0_i32, %c0_i32_0 : i32, i32
  }
  func.func @transform_6(%arg0: i32) -> (i32, i32) {
    %c0_i32 = arith.constant 0 : i32
    %c0_i32_0 = arith.constant 0 : i32
    return %arg0, %c0_i32 : i32, i32
  }
  func.func @transform_7(%arg0: i32) -> (i32, i32) {
    %c0_i32 = arith.constant 0 : i32
    %c0_i32_0 = arith.constant 0 : i32
    %c0_i32_1 = arith.constant 0 : i32
    return %c0_i32, %c0_i32_0 : i32, i32
  }
  func.func @transform_8(%arg0: i32) -> (i32, i32) {
    %c0_i32 = arith.constant 0 : i32
    %c0_i32_0 = arith.constant 0 : i32
    %c0_i32_1 = arith.constant 0 : i32
    return %c0_i32, %c0_i32_0 : i32, i32
  }
}

</mosaic_0001>

<bundles_post_ra>
// kernel: tpu_custom_call.1
= control target key start
LH: loop header
LB: loop body
LE: loop exit
PB: predicated region body
PF: predicated region fallthrough
CT: control target
= control target key end

     0   :  { %14 = vsyncpa [#allocation6], 0  ;;  %s2494_s0 = inlined_call_operand.vmem [shape: f32[40,10], index: 0, kind: input, shape index: {}]   ;;  %s2495_s1 = inlined_call_operand.hbm [shape: f32[10,512], index: 1, kind: input, shape index: {}]   ;;  %s2496_s2 = inlined_call_operand.vmem [shape: f32[1,512], index: 2, kind: input, shape index: {}]   ;;  %s2497_s3 = inlined_call_operand.hbm [shape: f32[128,512], index: 3, kind: input, shape index: {}]   ;;  %s2498_s4 = inlined_call_operand.vmem [shape: f32[8,128], index: 4, kind: input, shape index: {}]   ;;  %s2499_s5 = inlined_call_operand.vmem [shape: f32[8,128], index: 5, kind: input, shape index: {}]   ;;  %s2500_s6 = inlined_call_operand.hbm [shape: f32[40,128], index: 6, kind: output, shape index: {0}]   ;;  %s2501_s7 = inlined_call_operand.hbm [shape: f32[8,128], index: 7, kind: output, shape index: {1}]   ;;  %s2502_s8 = inlined_call_operand.hbm [shape: f32[8,128], index: 8, kind: output, shape index: {2}]  }
   0x1   :  { %15 = vsyncpa [#allocation9], 0 }
   0x2   :  { %16 = vsyncpa [#allocation7], 0 }
   0x3   :  { %17 = vsyncpa [#allocation12], 0  ;;  %s24_s29 = sshll.u32 %s2495_s1, 4  ;;  %s1705_s30 = smov [#allocation5]   ;;  %s25_s29 = int_to_ptr.hbm [resolvable:$true] %s24_s29 }
   0x4   :  { %s26_s9 = sshll.u32 %s1705_s30, 4  ;;  %s39_s12 = sshll.u32 %s2497_s3, 4  ;;  %s27_s9 = int_to_ptr.vmem [resolvable:$true] %s26_s9  ;;  %s40_s12 = int_to_ptr.hbm [resolvable:$true] %s39_s12 }
   0x5   :  { %s1706_s13 = smov 512   ;;  %s1707_s14 = smov 32  }
   0x6   :  { %32 = dma.hbm_to_vmem [thread:$0]  %s25_s29, 1024, %s27_s9, [#allocation6], %s1706_s13, %s1706_s13, %s1707_s14  }
   0x7   :  { %s1708_s15 = smov [#allocation8]  }
   0x8   :  { %s41_s16 = sshll.u32 %s1708_s15, 4  ;;  %s42_s16 = int_to_ptr.vmem [resolvable:$true] %s41_s16 }
   0x9   :  { %47 = dma.hbm_to_vmem [thread:$0]  %s40_s12, 8192, %s42_s16, [#allocation9], %s1706_s13, %s1706_s13, %s1707_s14  }
   0xa   :  { %1697 = dma.done.wait [#allocation6], 1024  }
   0xb   :  { %1698 = vsyncadd [#allocation6], 4294966272 }
   0xc   :  { %1699 = dma.done.wait [#allocation9], 8192  }
   0xd   :  { %1700 = vsyncadd [#allocation9], 4294959104  ;;  %vm107_vm0 = vcmask 1041408   ;;  %v77_v0 = vld [vmem:[#allocation5 + $0x20] sm:$0x3]  ;;  %v74_v5 = vld [vmem:[#allocation5 + $0x8] sm:$0xff] }
   0xe   :  { %v78_v1 = vld [vmem:[#allocation5 + $0x28] sm:$0x3]  ;;  %v79_v2 = vld [vmem:[#allocation5 + $0x30] sm:$0x3]  ;;  %1449 = vmatpush.msk.msra.mxu0 %vm107_vm0, %v77_v0  ;;  %v80_v3 = vld [vmem:[#allocation5 + $0x38] sm:$0x3] }
   0xf   :  { %1455 = vmatpush.msk.msra.mxu1 %vm107_vm0, %v78_v1  ;;  %v73_v4 = vld [vmem:[#allocation5] sm:$0xff]  ;;  %1461 = vmatpush.msk.msra.mxu2 %vm107_vm0, %v79_v2  ;;  %v75_v6 = vld [vmem:[#allocation5 + $0x10] sm:$0xff]  ;;  %v76_v7 = vld [vmem:[#allocation5 + $0x18] sm:$0xff]  ;;  %vm91_vm1 = vcmask 80896   ;;  %s1400_s9 = sshll.u32 %s2500_s6, 4  ;;  %s1710_s10 = smov [#allocation11]   ;;  %s1401_s9 = int_to_ptr.hbm [resolvable:$true] %s1400_s9 }
  0x10   :  { %1467 = vmatpush.msk.msra.mxu3 %vm107_vm0, %v80_v3  ;;  %v68_v8 = vld [vmem:[%s2494_s0] sm:$0xff]  ;;  %135 = vmatpush.msra.mxu0 %v73_v4  ;;  %v1770_v10 = vld [vmem:[#allocation8 + $0x1e8] sm:$0xff]  ;;  %v1774_v11 = vld [vmem:[#allocation8 + $0x1f0] sm:$0xff]  ;;  %s1412_s11 = sshll.u32 %s1710_s10, 4  ;;  %s1414_s14 = sshll.u32 %s2501_s7, 4  ;;  %s1413_s11 = int_to_ptr.vmem [resolvable:$true] %s1412_s11  ;;  %s1415_s14 = int_to_ptr.hbm [resolvable:$true] %s1414_s14 }
  0x11   :  { %167 = vmatpush.msra.mxu1 %v74_v5  ;;  %199 = vmatpush.msra.mxu2 %v75_v6  ;;  %v1768_v9 = vld [vmem:[#allocation8 + $0x1e0] sm:$0xff]  ;;  %v1780_v13 = vld [vmem:[#allocation8 + $0x1c8] sm:$0xff]  ;;  %v1782_v14 = vld [vmem:[#allocation8 + $0x1f8] sm:$0xff]  ;;  %s1711_s15 = smov [#allocation13]   ;;  %s1425_s17 = sshll.u32 %s2502_s8, 4  ;;  %s1426_s17 = int_to_ptr.hbm [resolvable:$true] %s1425_s17 }
  0x12   :  { %231 = vmatpush.msra.mxu3 %v76_v7  ;;  %1450 = vmatmul.msk.f32.vlgmr.msra.gmra.mxu0 %vm91_vm1, %v68_v8  ;;  %v1778_v12 = vld [vmem:[#allocation8 + $0x1c0] sm:$0xff]  ;;  %v1786_v15 = vld [vmem:[#allocation8 + $0x1d0] sm:$0xff]  ;;  %v1790_v17 = vld [vmem:[#allocation8 + $0x1a8] sm:$0xff]  ;;  %s1423_s16 = sshll.u32 %s1711_s15, 4  ;;  %s1712_s6 = smov 128   ;;  %s1424_s16 = int_to_ptr.vmem [resolvable:$true] %s1423_s16 }
  0x13   :  { %1456 = vmatmul.msk.f32.vlgmr.msra.gmra.mxu1 %vm91_vm1, %v68_v8  ;;  %1462 = vmatmul.msk.f32.vlgmr.msra.gmra.mxu2 %vm91_vm1, %v68_v8  ;;  %v1788_v16 = vld [vmem:[#allocation8 + $0x1a0] sm:$0xff]  ;;  %v1794_v18 = vld [vmem:[#allocation8 + $0x1d8] sm:$0xff]  ;;  %v1798_v19 = vld [vmem:[#allocation8 + $0x1b0] sm:$0xff]  ;;  %s1713_s7 = smov 8  }
  0x14   :  { %1468 = vmatmul.msk.f32.vlgmr.msra.gmra.mxu3 %vm91_vm1, %v68_v8  ;;  %341 = vmatpush.msrb.mxu0 %v1768_v9  ;;  %v1800_v20 = vld [vmem:[#allocation8 + $0x1b8] sm:$0xff]  ;;  %v69_v21 = vld [vmem:[%s2494_s0 + $0x8] sm:$0xff]  ;;  %v1809_v22 = vld [vmem:[#allocation8 + $0x180] sm:$0xff] }
  0x15   :  { %361 = vmatpush.msrb.mxu1 %v1770_v10  ;;  %381 = vmatpush.msrb.mxu2 %v1774_v11  ;;  %v1811_v23 = vld [vmem:[#allocation8 + $0x188] sm:$0xff]  ;;  %v1817_v24 = vld [vmem:[#allocation8 + $0x190] sm:$0xff]  ;;  %v1819_v25 = vld [vmem:[#allocation8 + $0x198] sm:$0xff] }
  0x16   :  { %401 = vmatpush.msrb.mxu3 %v1782_v14  ;;  %342 = vmatpush.msrb.mxu0 %v1778_v12  ;;  %v1823_v26 = vld [vmem:[#allocation8 + $0x160] sm:$0xff]  ;;  %v1825_v27 = vld [vmem:[#allocation8 + $0x168] sm:$0xff]  ;;  %v1829_v28 = vld [vmem:[#allocation8 + $0x170] sm:$0xff] }
  0x17   :  { %362 = vmatpush.msrb.mxu1 %v1780_v13  ;;  %382 = vmatpush.msrb.mxu2 %v1786_v15  ;;  %v1831_v29 = vld [vmem:[#allocation8 + $0x178] sm:$0xff]  ;;  %v1833_v30 = vld [vmem:[#allocation8 + $0x140] sm:$0xff]  ;;  %v1835_v31 = vld [vmem:[#allocation8 + $0x148] sm:$0xff] }
  0x18   :  { %402 = vmatpush.msrb.mxu3 %v1794_v18  ;;  %343 = vmatpush.msrb.mxu0 %v1788_v16  ;;  %v1841_v32 = vld [vmem:[#allocation8 + $0x150] sm:$0xff]  ;;  %v1843_v33 = vld [vmem:[#allocation8 + $0x158] sm:$0xff]  ;;  %v1845_v34 = vld [vmem:[#allocation8 + $0x120] sm:$0xff] }
  0x19   :  { %363 = vmatpush.msrb.mxu1 %v1790_v17  ;;  %383 = vmatpush.msrb.mxu2 %v1798_v19  ;;  %v1847_v35 = vld [vmem:[#allocation8 + $0x128] sm:$0xff]  ;;  %v70_v36 = vld [vmem:[%s2494_s0 + $0x10] sm:$0xff]  ;;  %v1860_v37 = vld [vmem:[#allocation8 + $0x100] sm:$0xff] }
  0x1a   :  { %403 = vmatpush.msrb.mxu3 %v1800_v20  ;;  %1451 = vmatmul.msk.f32.gmra.mxu0 %vm91_vm1, %v69_v21  ;;  %v1862_v38 = vld [vmem:[#allocation8 + $0x108] sm:$0xff]  ;;  %v1866_v39 = vld [vmem:[#allocation8 + $0x130] sm:$0xff]  ;;  %v1868_v40 = vld [vmem:[#allocation8 + $0x138] sm:$0xff] }
  0x1b   :  { %1457 = vmatmul.msk.f32.gmra.mxu1 %vm91_vm1, %v69_v21  ;;  %1463 = vmatmul.msk.f32.gmra.mxu2 %vm91_vm1, %v69_v21  ;;  %v1872_v41 = vld [vmem:[#allocation8 + $0xe0] sm:$0xff]  ;;  %v1874_v42 = vld [vmem:[#allocation8 + $0xe8] sm:$0xff]  ;;  %v1878_v43 = vld [vmem:[#allocation8 + $0x110] sm:$0xff] }
  0x1c   :  { %1469 = vmatmul.msk.f32.gmra.mxu3 %vm91_vm1, %v69_v21  ;;  %344 = vmatpush.msrb.mxu0 %v1809_v22  ;;  %v1880_v44 = vld [vmem:[#allocation8 + $0x118] sm:$0xff]  ;;  %v1884_v45 = vld [vmem:[#allocation8 + $0xc0] sm:$0xff]  ;;  %v1886_v46 = vld [vmem:[#allocation8 + $0xc8] sm:$0xff] }
  0x1d   :  { %364 = vmatpush.msrb.mxu1 %v1811_v23  ;;  %384 = vmatpush.msrb.mxu2 %v1817_v24  ;;  %v1890_v47 = vld [vmem:[#allocation8 + $0xf0] sm:$0xff]  ;;  %v1892_v48 = vld [vmem:[#allocation8 + $0xf8] sm:$0xff]  ;;  %v1901_v50 = vld [vmem:[#allocation8 + $0xa0] sm:$0xff] }
  0x1e   :  { %404 = vmatpush.msrb.mxu3 %v1819_v25  ;;  %345 = vmatpush.msrb.mxu0 %v1823_v26  ;;  %v71_v49 = vld [vmem:[%s2494_s0 + $0x18] sm:$0xff]  ;;  %v1903_v51 = vld [vmem:[#allocation8 + $0xa8] sm:$0xff]  ;;  %v1909_v52 = vld [vmem:[#allocation8 + $0xd0] sm:$0xff] }
  0x1f   :  { %365 = vmatpush.msrb.mxu1 %v1825_v27  ;;  %385 = vmatpush.msrb.mxu2 %v1829_v28  ;;  %v1911_v53 = vld [vmem:[#allocation8 + $0xd8] sm:$0xff]  ;;  %v1915_v54 = vld [vmem:[#allocation8 + $0x80] sm:$0xff]  ;;  %v1917_v55 = vld [vmem:[#allocation8 + $0x88] sm:$0xff] }
  0x20   :  { %405 = vmatpush.msrb.mxu3 %v1831_v29  ;;  %346 = vmatpush.msrb.mxu0 %v1833_v30  ;;  %v1921_v56 = vld [vmem:[#allocation8 + $0xb0] sm:$0xff]  ;;  %v1923_v57 = vld [vmem:[#allocation8 + $0xb8] sm:$0xff]  ;;  %v1927_v58 = vld [vmem:[#allocation8 + $0x60] sm:$0xff] }
  0x21   :  { %366 = vmatpush.msrb.mxu1 %v1835_v31  ;;  %386 = vmatpush.msrb.mxu2 %v1841_v32  ;;  %v1929_v59 = vld [vmem:[#allocation8 + $0x68] sm:$0xff]  ;;  %v1933_v60 = vld [vmem:[#allocation8 + $0x90] sm:$0xff]  ;;  %v1935_v61 = vld [vmem:[#allocation8 + $0x98] sm:$0xff] }
  0x22   :  { %406 = vmatpush.msrb.mxu3 %v1843_v33  ;;  %347 = vmatpush.msrb.mxu0 %v1845_v34  ;;  %v72_v62 = vld [vmem:[%s2494_s0 + $0x20] sm:$0xff]  ;;  %v1948_v0 = vld [vmem:[#allocation8 + $0x48] sm:$0xff]  ;;  %v1952_v1 = vld [vmem:[#allocation8 + $0x70] sm:$0xff] }
  0x23   :  { %367 = vmatpush.msrb.mxu1 %v1847_v35  ;;  %1452 = vmatmul.msk.f32.gmra.mxu0 %vm91_vm1, %v70_v36  ;;  %v1946_v63 = vld [vmem:[#allocation8 + $0x40] sm:$0xff]  ;;  %v1954_v2 = vld [vmem:[#allocation8 + $0x78] sm:$0xff]  ;;  %v1960_v4 = vld [vmem:[#allocation8 + $0x28] sm:$0xff] }
  0x24   :  { %1458 = vmatmul.msk.f32.gmra.mxu1 %vm91_vm1, %v70_v36  ;;  %1464 = vmatmul.msk.f32.gmra.mxu2 %vm91_vm1, %v70_v36  ;;  %v1958_v3 = vld [vmem:[#allocation8 + $0x20] sm:$0xff]  ;;  %v1964_v5 = vld [vmem:[#allocation8 + $0x50] sm:$0xff]  ;;  %v1966_v6 = vld [vmem:[#allocation8 + $0x58] sm:$0xff] }
  0x25   :  { %1470 = vmatmul.msk.f32.gmra.mxu3 %vm91_vm1, %v70_v36  ;;  %348 = vmatpush.msrb.mxu0 %v1860_v37  ;;  %2512 = vst [vmem:[#allocation18_spill] sm:$0xff] %v1958_v3  ;;  %v1970_v7 = vld [vmem:[#allocation8] sm:$0xff]  ;;  %v1972_v8 = vld [vmem:[#allocation8 + $0x8] sm:$0xff]  ;;  %v1976_v21 = vld [vmem:[#allocation8 + $0x30] sm:$0xff] }
  0x26   :  { %368 = vmatpush.msrb.mxu1 %v1862_v38  ;;  %387 = vmatpush.msrb.mxu2 %v1866_v39  ;;  %v1978_v36 = vld [vmem:[#allocation8 + $0x38] sm:$0xff] }
  0x27   :  { %407 = vmatpush.msrb.mxu3 %v1868_v40  ;;  %349 = vmatpush.msrb.mxu0 %v1872_v41 }
  0x28   :  { %369 = vmatpush.msrb.mxu1 %v1874_v42  ;;  %388 = vmatpush.msrb.mxu2 %v1878_v43 }
  0x29   :  { %408 = vmatpush.msrb.mxu3 %v1880_v44  ;;  %350 = vmatpush.msrb.mxu0 %v1884_v45 }
  0x2a   :  { %370 = vmatpush.msrb.mxu1 %v1886_v46  ;;  %389 = vmatpush.msrb.mxu2 %v1890_v47 }
  0x2b   :  { %409 = vmatpush.msrb.mxu3 %v1892_v48  ;;  %1453 = vmatmul.msk.f32.gmra.mxu0 %vm91_vm1, %v71_v49 }
  0x2c   :  { %1459 = vmatmul.msk.f32.gmra.mxu1 %vm91_vm1, %v71_v49  ;;  %1465 = vmatmul.msk.f32.gmra.mxu2 %vm91_vm1, %v71_v49 }
  0x2d   :  { %1471 = vmatmul.msk.f32.gmra.mxu3 %vm91_vm1, %v71_v49  ;;  %351 = vmatpush.msrb.mxu0 %v1901_v50  ;;  %v64_v49 = vld [vmem:[%s2498_s4] sm:$0xff] }
  0x2e   :  { %371 = vmatpush.msrb.mxu1 %v1903_v51  ;;  %390 = vmatpush.msrb.mxu2 %v1909_v52 }
  0x2f   :  { %410 = vmatpush.msrb.mxu3 %v1911_v53  ;;  %352 = vmatpush.msrb.mxu0 %v1915_v54 }
  0x30   :  { %372 = vmatpush.msrb.mxu1 %v1917_v55  ;;  %391 = vmatpush.msrb.mxu2 %v1921_v56 }
  0x31   :  { %411 = vmatpush.msrb.mxu3 %v1923_v57  ;;  %353 = vmatpush.msrb.mxu0 %v1927_v58 }
  0x32   :  { %373 = vmatpush.msrb.mxu1 %v1929_v59  ;;  %392 = vmatpush.msrb.mxu2 %v1933_v60 }
  0x33   :  { %412 = vmatpush.msrb.mxu3 %v1935_v61  ;;  %1454 = vmatmul.msk.f32.gmra.mxu0 %vm91_vm1, %v72_v62 }
  0x34   :  { %1460 = vmatmul.msk.f32.gmra.mxu1 %vm91_vm1, %v72_v62  ;;  %1466 = vmatmul.msk.f32.gmra.mxu2 %vm91_vm1, %v72_v62 }
  0x35   :  { %1472 = vmatmul.msk.f32.gmra.mxu3 %vm91_vm1, %v72_v62  ;;  %354 = vmatpush.msrb.mxu0 %v1946_v63  ;;  %v1987_v62 = vld [vmem:[#allocation8 + $0x10] sm:$0xff] }
  0x36   :  { %374 = vmatpush.msrb.mxu1 %v1948_v0  ;;  %393 = vmatpush.msrb.mxu2 %v1952_v1 }
  0x37   :  { %413 = vmatpush.msrb.mxu3 %v1954_v2  ;;  %355 = vmatpush.msrb.mxu0 %v1958_v3  ;;  %v1989_v3 = vld [vmem:[#allocation8 + $0x18] sm:$0xff] }
  0x38   :  { %375 = vmatpush.msrb.mxu1 %v1960_v4  ;;  %394 = vmatpush.msrb.mxu2 %v1964_v5 }
  0x39   :  { %414 = vmatpush.msrb.mxu3 %v1966_v6  ;;  %356 = vmatpush.msrb.mxu0 %v1970_v7 }
  0x3a   :  { %376 = vmatpush.msrb.mxu1 %v1972_v8  ;;  %395 = vmatpush.msrb.mxu2 %v1976_v21 }
  0x3b   :  { %415 = vmatpush.msrb.mxu3 %v1978_v36  ;;  %357 = vmatmul.f32.vlgmr.msrb.gmra.mxu0 %v64_v49 }
  0x3c   :  { %377 = vmatmul.f32.vlgmr.msrb.gmra.mxu1 %v64_v49  ;;  %396 = vmatpush.msrb.mxu2 %v1987_v62 }
  0x3d   :  { %416 = vmatpush.msrb.mxu3 %v1989_v3  ;;  %397 = vmatmul.f32.vlgmr.msrb.gmra.mxu2 %v64_v49 }
  0x3e   :  { %417 = vmatmul.f32.vlgmr.msrb.gmra.mxu3 %v64_v49  ;;  %564 = vmatpush.msra.mxu0 %v1768_v9  ;;  %v2513_v49 = vld [vmem:[#allocation18_spill] sm:$0xff] }
  0x3f   :  { %584 = vmatpush.msra.mxu1 %v1770_v10  ;;  %604 = vmatpush.msra.mxu2 %v1774_v11 }
  0x40   :  { %624 = vmatpush.msra.mxu3 %v1782_v14  ;;  %565 = vmatpush.msra.mxu0 %v1778_v12 }
  0x41   :  { %585 = vmatpush.msra.mxu1 %v1780_v13  ;;  %605 = vmatpush.msra.mxu2 %v1786_v15 }
  0x42   :  { %625 = vmatpush.msra.mxu3 %v1794_v18  ;;  %566 = vmatpush.msra.mxu0 %v1788_v16 }
  0x43   :  { %586 = vmatpush.msra.mxu1 %v1790_v17  ;;  %606 = vmatpush.msra.mxu2 %v1798_v19 }
  0x44   :  { %626 = vmatpush.msra.mxu3 %v1800_v20  ;;  %567 = vmatpush.msra.mxu0 %v1809_v22 }
  0x45   :  { %587 = vmatpush.msra.mxu1 %v1811_v23  ;;  %607 = vmatpush.msra.mxu2 %v1817_v24 }
  0x46   :  { %627 = vmatpush.msra.mxu3 %v1819_v25  ;;  %568 = vmatpush.msra.mxu0 %v1823_v26 }
  0x47   :  { %588 = vmatpush.msra.mxu1 %v1825_v27  ;;  %608 = vmatpush.msra.mxu2 %v1829_v28 }
  0x48   :  { %628 = vmatpush.msra.mxu3 %v1831_v29  ;;  %569 = vmatpush.msra.mxu0 %v1833_v30 }
  0x49   :  { %589 = vmatpush.msra.mxu1 %v1835_v31  ;;  %609 = vmatpush.msra.mxu2 %v1841_v32 }
  0x4a   :  { %629 = vmatpush.msra.mxu3 %v1843_v33  ;;  %570 = vmatpush.msra.mxu0 %v1845_v34 }
  0x4b   :  { %590 = vmatpush.msra.mxu1 %v1847_v35  ;;  %610 = vmatpush.msra.mxu2 %v1866_v39 }
  0x4c   :  { %630 = vmatpush.msra.mxu3 %v1868_v40  ;;  %571 = vmatpush.msra.mxu0 %v1860_v37 }
  0x4d   :  { %591 = vmatpush.msra.mxu1 %v1862_v38  ;;  %611 = vmatpush.msra.mxu2 %v1878_v43 }
  0x4e   :  { %631 = vmatpush.msra.mxu3 %v1880_v44  ;;  %572 = vmatpush.msra.mxu0 %v1872_v41 }
  0x4f   :  { %592 = vmatpush.msra.mxu1 %v1874_v42  ;;  %612 = vmatpush.msra.mxu2 %v1890_v47 }
  0x50   :  { %632 = vmatpush.msra.mxu3 %v1892_v48  ;;  %573 = vmatpush.msra.mxu0 %v1884_v45 }
  0x51   :  { %593 = vmatpush.msra.mxu1 %v1886_v46  ;;  %613 = vmatpush.msra.mxu2 %v1909_v52 }
  0x52   :  { %633 = vmatpush.msra.mxu3 %v1911_v53  ;;  %574 = vmatpush.msra.mxu0 %v1901_v50 }
  0x53   :  { %594 = vmatpush.msra.mxu1 %v1903_v51  ;;  %614 = vmatpush.msra.mxu2 %v1921_v56 }
  0x54   :  { %634 = vmatpush.msra.mxu3 %v1923_v57  ;;  %575 = vmatpush.msra.mxu0 %v1915_v54 }
  0x55   :  { %595 = vmatpush.msra.mxu1 %v1917_v55  ;;  %615 = vmatpush.msra.mxu2 %v1933_v60 }
  0x56   :  { %635 = vmatpush.msra.mxu3 %v1935_v61  ;;  %576 = vmatpush.msra.mxu0 %v1927_v58 }
  0x57   :  { %596 = vmatpush.msra.mxu1 %v1929_v59  ;;  %616 = vmatpush.msra.mxu2 %v1952_v1 }
  0x58   :  { %636 = vmatpush.msra.mxu3 %v1954_v2  ;;  %577 = vmatpush.msra.mxu0 %v1946_v63 }
  0x59   :  { %597 = vmatpush.msra.mxu1 %v1948_v0  ;;  %617 = vmatpush.msra.mxu2 %v1964_v5 }
  0x5a   :  { %637 = vmatpush.msra.mxu3 %v1966_v6  ;;  %578 = vmatpush.msra.mxu0 %v2513_v49 }
  0x5b   :  { %598 = vmatpush.msra.mxu1 %v1960_v4  ;;  %618 = vmatpush.msra.mxu2 %v1976_v21 }
  0x5c   :  { %638 = vmatpush.msra.mxu3 %v1978_v36  ;;  %579 = vmatpush.msra.mxu0 %v1970_v7 }
  0x5d   :  { %599 = vmatpush.msra.mxu1 %v1972_v8  ;;  %619 = vmatpush.msra.mxu2 %v1987_v62 }
  0x5e   :  { %639 = vmatpush.msra.mxu3 %v1989_v3  ;;  %788 = vmatpush.msrb.mxu0 %v1768_v9 }
  0x5f   :  { %808 = vmatpush.msrb.mxu1 %v1770_v10  ;;  %828 = vmatpush.msrb.mxu2 %v1774_v11  ;;  %v81_v11 = vld [vmem:[%s2496_s2] sm:$0xf] }
  0x60   :  { %848 = vmatpush.msrb.mxu3 %v1782_v14  ;;  %789 = vmatpush.msrb.mxu0 %v1778_v12  ;;  %v83_v12 = vperm.slane %v81_v11, 0 }
  0x61   :  { %809 = vmatpush.msrb.mxu1 %v1780_v13  ;;  %829 = vmatpush.msrb.mxu2 %v1786_v15  ;;  %v84_v13 = vperm.slane %v81_v11, 1 }
  0x62   :  { %849 = vmatpush.msrb.mxu3 %v1794_v18  ;;  %790 = vmatpush.msrb.mxu0 %v1788_v16 }
  0x63   :  { %810 = vmatpush.msrb.mxu1 %v1790_v17  ;;  %830 = vmatpush.msrb.mxu2 %v1798_v19 }
  0x64   :  { %850 = vmatpush.msrb.mxu3 %v1800_v20  ;;  %791 = vmatpush.msrb.mxu0 %v1809_v22  ;;  %v85_v20 = vperm.slane %v81_v11, 2  ;;  %v86_v22 = vperm.slane %v81_v11, 3 }
  0x65   :  { %811 = vmatpush.msrb.mxu1 %v1811_v23  ;;  %831 = vmatpush.msrb.mxu2 %v1817_v24 }
  0x66   :  { %851 = vmatpush.msrb.mxu3 %v1819_v25  ;;  %792 = vmatpush.msrb.mxu0 %v1823_v26 }
  0x67   :  { %812 = vmatpush.msrb.mxu1 %v1825_v27  ;;  %832 = vmatpush.msrb.mxu2 %v1829_v28 }
  0x68   :  { %852 = vmatpush.msrb.mxu3 %v1831_v29  ;;  %793 = vmatpush.msrb.mxu0 %v1833_v30 }
  0x69   :  { %813 = vmatpush.msrb.mxu1 %v1835_v31  ;;  %833 = vmatpush.msrb.mxu2 %v1841_v32 }
  0x6a   :  { %853 = vmatpush.msrb.mxu3 %v1843_v33  ;;  %794 = vmatpush.msrb.mxu0 %v1845_v34 }
  0x6b   :  { %814 = vmatpush.msrb.mxu1 %v1847_v35  ;;  %834 = vmatpush.msrb.mxu2 %v1866_v39 }
  0x6c   :  { %854 = vmatpush.msrb.mxu3 %v1868_v40  ;;  %795 = vmatpush.msrb.mxu0 %v1860_v37 }
  0x6d   :  { %815 = vmatpush.msrb.mxu1 %v1862_v38  ;;  %835 = vmatpush.msrb.mxu2 %v1878_v43 }
  0x6e   :  { %855 = vmatpush.msrb.mxu3 %v1880_v44  ;;  %796 = vmatpush.msrb.mxu0 %v1872_v41 }
  0x6f   :  { %816 = vmatpush.msrb.mxu1 %v1874_v42  ;;  %836 = vmatpush.msrb.mxu2 %v1890_v47 }
  0x70   :  { %856 = vmatpush.msrb.mxu3 %v1892_v48  ;;  %797 = vmatpush.msrb.mxu0 %v1884_v45 }
  0x71   :  { %817 = vmatpush.msrb.mxu1 %v1886_v46  ;;  %837 = vmatpush.msrb.mxu2 %v1909_v52 }
  0x72   :  { %857 = vmatpush.msrb.mxu3 %v1911_v53  ;;  %798 = vmatpush.msrb.mxu0 %v1901_v50 }
  0x73   :  { %818 = vmatpush.msrb.mxu1 %v1903_v51  ;;  %838 = vmatpush.msrb.mxu2 %v1921_v56 }
  0x74   :  { %858 = vmatpush.msrb.mxu3 %v1923_v57  ;;  %799 = vmatpush.msrb.mxu0 %v1915_v54 }
  0x75   :  { %819 = vmatpush.msrb.mxu1 %v1917_v55  ;;  %839 = vmatpush.msrb.mxu2 %v1933_v60 }
  0x76   :  { %859 = vmatpush.msrb.mxu3 %v1935_v61  ;;  %800 = vmatpush.msrb.mxu0 %v1927_v58 }
  0x77   :  { %820 = vmatpush.msrb.mxu1 %v1929_v59  ;;  %840 = vmatpush.msrb.mxu2 %v1952_v1 }
  0x78   :  { %860 = vmatpush.msrb.mxu3 %v1954_v2  ;;  %801 = vmatpush.msrb.mxu0 %v1946_v63 }
  0x79   :  { %821 = vmatpush.msrb.mxu1 %v1948_v0  ;;  %841 = vmatpush.msrb.mxu2 %v1964_v5 }
  0x7a   :  { %861 = vmatpush.msrb.mxu3 %v1966_v6  ;;  %802 = vmatpush.msrb.mxu0 %v2513_v49 }
  0x7b   :  { %822 = vmatpush.msrb.mxu1 %v1960_v4  ;;  %842 = vmatpush.msrb.mxu2 %v1976_v21 }
  0x7c   :  { %862 = vmatpush.msrb.mxu3 %v1978_v36  ;;  %803 = vmatpush.msrb.mxu0 %v1970_v7 }
  0x7d   :  { %823 = vmatpush.msrb.mxu1 %v1972_v8  ;;  %843 = vmatpush.msrb.mxu2 %v1987_v62 }
  0x7e   :  { %863 = vmatpush.msrb.mxu3 %v1989_v3 }
  0x8f   :  { %v137_v9 = vpop.f32.mrf.mxu0 }
  0x90   :  { %v169_v10 = vpop.f32.mrf.mxu1  ;;  %v138_v48 = vadd.f32 %v137_v9, %v83_v12 }
  0x91   :  { %v170_v50 = vadd.f32 %v169_v10, %v84_v13 }
  0x96   :  { %v201_v14 = vpop.f32.mrf.mxu2 }
  0x97   :  { %v233_v15 = vpop.f32.mrf.mxu3  ;;  %v140_v16 = vpop.f32.mrf.mxu0  ;;  %v202_v61 = vadd.f32 %v201_v14, %v85_v20 }
  0x98   :  { %v172_v17 = vpop.f32.mrf.mxu1  ;;  %v2126_v18 = vadd.f32 %v140_v16, %v83_v12  ;;  %v234_v7 = vadd.f32 %v233_v15, %v86_v22 }
  0x99   :  { %v2128_v19 = vadd.f32 %v172_v17, %v84_v13 }
  0x9e   :  { %v204_v23 = vpop.f32.mrf.mxu2 }
  0x9f   :  { %v236_v24 = vpop.f32.mrf.mxu3  ;;  %v2130_v25 = vadd.f32 %v204_v23, %v85_v20 }
  0xa0   :  { %v2132_v26 = vadd.f32 %v236_v24, %v86_v22  ;;  %v143_v27 = vpop.f32.mrf.mxu0 }
  0xa1   :  { %v175_v28 = vpop.f32.mrf.mxu1  ;;  %v2134_v29 = vadd.f32 %v143_v27, %v83_v12  ;;  %v66_v27 = vld [vmem:[%s2499_s5] sm:$0xff]  ;;  %s1709_s5 = smov [#allocation10]  }
  0xa2   :  { %v2136_v30 = vadd.f32 %v175_v28, %v84_v13  ;;  %s1398_s28 = sshll.u32 %s1709_s5, 4  ;;  %s1399_s28 = int_to_ptr.vmem [resolvable:$true] %s1398_s28 }
  0xa7   :  { %v207_v31 = vpop.f32.mrf.mxu2 }
  0xa8   :  { %v239_v32 = vpop.f32.mrf.mxu3  ;;  %v2138_v33 = vadd.f32 %v207_v31, %v85_v20  ;;  %v146_v35 = vpop.f32.mrf.mxu0 }
  0xa9   :  { %v2140_v34 = vadd.f32 %v239_v32, %v86_v22  ;;  %v178_v37 = vpop.f32.mrf.mxu1  ;;  %v2142_v38 = vadd.f32 %v146_v35, %v83_v12 }
  0xaa   :  { %v2144_v39 = vadd.f32 %v178_v37, %v84_v13 }
  0xab   :  { %2514 = vst [vmem:[#allocation18_spill] sm:$0xff] %v2142_v38  ;;  %v2345_v38 = vld [vmem:[#allocation8 + $0x30] sm:$0xff] }
  0xac   :  { %2515 = vst [vmem:[#allocation19_spill] sm:$0xff] %v2144_v39  ;;  %v2341_v39 = vld [vmem:[#allocation8 + $0x28] sm:$0xff] }
  0xaf   :  { %v210_v40 = vpop.f32.mrf.mxu2 }
  0xb0   :  { %v242_v41 = vpop.f32.mrf.mxu3  ;;  %v2146_v42 = vadd.f32 %v210_v40, %v85_v20  ;;  %v149_v44 = vpop.f32.mrf.mxu0 }
  0xb1   :  { %v2148_v43 = vadd.f32 %v242_v41, %v86_v22  ;;  %v181_v45 = vpop.f32.mrf.mxu1  ;;  %v2150_v46 = vadd.f32 %v149_v44, %v83_v12 }
  0xb2   :  { %2516 = vst [vmem:[#allocation20_spill] sm:$0xff] %v2146_v42  ;;  %v2152_v47 = vadd.f32 %v181_v45, %v84_v13  ;;  %v2339_v42 = vld [vmem:[#allocation8 + $0x20] sm:$0xff] }
  0xb3   :  { %2517 = vst [vmem:[#allocation21_spill] sm:$0xff] %v2148_v43 }
  0xb4   :  { %2518 = vst [vmem:[#allocation22_spill] sm:$0xff] %v2150_v46  ;;  %v2332_v46 = vld [vmem:[#allocation8 + $0x50] sm:$0xff] }
  0xb5   :  { %2519 = vst [vmem:[#allocation23_spill] sm:$0xff] %v2152_v47  ;;  %v2330_v47 = vld [vmem:[#allocation8 + $0x48] sm:$0xff] }
  0xb6   :  { %2528 = vst [vmem:[#allocation32_spill] sm:$0xff] %v2330_v47 }
  0xb7   :  { %v213_v51 = vpop.f32.mrf.mxu2 }
  0xb8   :  { %v245_v52 = vpop.f32.mrf.mxu3  ;;  %v2154_v53 = vadd.f32 %v213_v51, %v85_v20  ;;  %v358_v55 = vpop.f32.mrf.mxu0 }
  0xb9   :  { %v2156_v54 = vadd.f32 %v245_v52, %v86_v22  ;;  %v378_v56 = vpop.f32.mrf.mxu1  ;;  %v421_v57 = vadd.f32 %v358_v55, %v138_v48 }
  0xba   :  { %2520 = vst [vmem:[#allocation24_spill] sm:$0xff] %v2154_v53  ;;  %v422_v58 = vadd.f32 %v378_v56, %v170_v50 }
  0xbb   :  { %2521 = vst [vmem:[#allocation25_spill] sm:$0xff] %v2156_v54  ;;  %v1473_v59 = vmul.f32 -1.442695, %v421_v57  ;;  %v2324_v54 = vld [vmem:[#allocation8 + $0x78] sm:$0xff] }
  0xbc   :  { %v1474_v60 = vmul.f32 -1.442695, %v422_v58  ;;  %2526 = vst [vmem:[#allocation30_spill] sm:$0xff] %v2324_v54 }
  0xbd   :  { %1497 = vpow2.f32 %v1473_v59 }
  0xbe   :  { %1499 = vpow2.f32 %v1474_v60 }
  0xc0   :  { %v398_v63 = vpop.f32.mrf.mxu2 }
  0xc1   :  { %v423_v0 = vadd.f32 %v398_v63, %v202_v61  ;;  %v418_v6 = vpop.f32.mrf.mxu3 }
  0xc2   :  { %v424_v62 = vadd.f32 %v418_v6, %v234_v7 }
  0xc3   :  { %v1498_v1 = vpop.eup %1497  ;;  %v1475_v2 = vmul.f32 -1.442695, %v423_v0 }
  0xc4   :  { %v1500_v3 = vpop.eup %1499  ;;  %v428_v4 = vadd.f32 1.0, %v1498_v1 }
  0xc5   :  { %v447_v5 = vadd.f32 1.0, %v1500_v3  ;;  %1501 = vpow2.f32 %v1475_v2 }
  0xc6   :  { %1503 = vrcp.f32 %v428_v4  ;;  %v440_v12 = vand.u32 2147483648, %v428_v4  ;;  %v438_v16 = vand.u32 2147483647, %v428_v4  ;;  %vm434_vm4 = vweird.f32 %v428_v4 }
  0xc7   :  { %1505 = vrcp.f32 %v447_v5  ;;  %v459_v17 = vand.u32 2147483648, %v447_v5  ;;  %v457_v23 = vand.u32 2147483647, %v447_v5  ;;  %vm453_vm6 = vweird.f32 %v447_v5 }
  0xc8   :  { %v441_v24 = vor.u32 1.1754944e-38, %v440_v12  ;;  %vm439_vm7 = vcmp.eq.f32.partialorder %v438_v16, 8.507059e+37 }
  0xc9   :  { %v460_v35 = vor.u32 1.1754944e-38, %v459_v17  ;;  %vm458_vm9 = vcmp.eq.f32.partialorder %v457_v23, 8.507059e+37 }
  0xcb   :  { %v1502_v8 = vpop.eup %1501 }
  0xcc   :  { %v1504_v21 = vpop.eup %1503  ;;  %v466_v36 = vadd.f32 1.0, %v1502_v8 }
  0xcd   :  { %v1506_v49 = vpop.eup %1505  ;;  %v430_v9 = vmul.f32 %v1504_v21, %v428_v4  ;;  %vm435_vm2 = vweird.f32 %v1504_v21 }
  0xce   :  { %v449_v10 = vmul.f32 %v1506_v49, %v447_v5  ;;  %1507 = vrcp.f32 %v466_v36  ;;  %vm454_vm3 = vweird.f32 %v1506_v49  ;;  %vm436_vm5 = vmor %vm434_vm4, %vm435_vm2  ;;  %v478_v56 = vand.u32 2147483648, %v466_v36 }
  0xcf   :  { %v431_v11 = vsub.f32 1.0, %v430_v9  ;;  %1509 = vtanh.f32 %v424_v62  ;;  %vm455_vm8 = vmor %vm453_vm6, %vm454_vm3  ;;  %vm472_vm11 = vweird.f32 %v466_v36  ;;  %v476_v57 = vand.u32 2147483647, %v466_v36 }
  0xd0   :  { %v450_v13 = vsub.f32 1.0, %v449_v10  ;;  %v479_v59 = vor.u32 1.1754944e-38, %v478_v56 }
  0xd1   :  { %v432_v14 = vmul.f32 %v1504_v21, %v431_v11  ;;  %vm477_vm13 = vcmp.eq.f32.partialorder %v476_v57, 8.507059e+37 }
  0xd2   :  { %v451_v20 = vmul.f32 %v1506_v49, %v450_v13 }
  0xd3   :  { %v433_v15 = vadd.f32 %v1504_v21, %v432_v14 }
  0xd4   :  { %v1508_v22 = vpop.eup %1507  ;;  %v452_v28 = vadd.f32 %v1506_v49, %v451_v20 }
  0xd5   :  { %v468_v31 = vmul.f32 %v1508_v22, %v466_v36  ;;  %v437_v32 = vsel %vm436_vm5, %v1504_v21, %v433_v15  ;;  %v1510_v37 = vpop.eup %1509  ;;  %vm473_vm10 = vweird.f32 %v1508_v22 }
  0xd6   :  { %v442_v40 = vsel %vm439_vm7, %v441_v24, %v437_v32  ;;  %v456_v41 = vsel %vm455_vm8, %v1506_v49, %v452_v28  ;;  %vm474_vm12 = vmor %vm472_vm11, %vm473_vm10 }
  0xd7   :  { %v469_v44 = vsub.f32 1.0, %v468_v31  ;;  %v461_v45 = vsel %vm458_vm9, %v460_v35, %v456_v41  ;;  %v483_v48 = vmul.f32 %v442_v40, %v66_v27 }
  0xd8   :  { %v484_v50 = vmul.f32 %v1510_v37, %v461_v45 }
  0xd9   :  { %v470_v51 = vmul.f32 %v1508_v22, %v469_v44 }
  0xda   :  { %v2161_v52 = vadd.f32 %v484_v50, %v483_v48 }
  0xdb   :  { %v471_v55 = vadd.f32 %v1508_v22, %v470_v51 }
  0xdc   :  { %1511 = vtanh.f32 %v2161_v52 }
  0xdd   :  { %v475_v58 = vsel %vm474_vm12, %v1508_v22, %v471_v55 }
  0xde   :  { %v480_v61 = vsel %vm477_vm13, %v479_v59, %v475_v58 }
  0xe2   :  { %v1512_v60 = vpop.eup %1511 }
  0xe3   :  { %v487_v63 = vmul.f32 %v1512_v60, %v480_v61 }
  0xe5   :  { %580 = vmatmul.f32.vlgmr.msra.gmra.mxu0 %v487_v63  ;;  %490 = vst [vmem:[#allocation10] sm:$0xff] %v487_v63  ;;  %600 = vmatmul.f32.vlgmr.msra.gmra.mxu1 %v487_v63 }
  0xe6   :  { %620 = vmatmul.f32.vlgmr.msra.gmra.mxu2 %v487_v63  ;;  %640 = vmatmul.f32.vlgmr.msra.gmra.mxu3 %v487_v63 }
 0x162   :  { %v581_v0 = vpop.f32.mrf.mxu0  ;;  %v601_v1 = vpop.f32.mrf.mxu1 }
 0x163   :  { %v644_v2 = vadd.f32 %v581_v0, %v2126_v18  ;;  %v645_v3 = vadd.f32 %v601_v1, %v2128_v19 }
 0x165   :  { %v1476_v4 = vmul.f32 -1.442695, %v644_v2  ;;  %v1477_v5 = vmul.f32 -1.442695, %v645_v3  ;;  %v2174_v2 = vld [vmem:[#allocation8 + $0x1e8] sm:$0xff]  ;;  %v2176_v3 = vld [vmem:[#allocation8 + $0x1f0] sm:$0xff] }
 0x166   :  { %1032 = vmatpush.msra.mxu1 %v2174_v2  ;;  %1052 = vmatpush.msra.mxu2 %v2176_v3 }
 0x167   :  { %1513 = vpow2.f32 %v1476_v4  ;;  %v2180_v4 = vld [vmem:[#allocation8 + $0x1f8] sm:$0xff] }
 0x168   :  { %1515 = vpow2.f32 %v1477_v5  ;;  %1072 = vmatpush.msra.mxu3 %v2180_v4  ;;  %v2184_v5 = vld [vmem:[#allocation8 + $0x1c0] sm:$0xff] }
 0x169   :  { %v621_v6 = vpop.f32.mrf.mxu2  ;;  %v641_v9 = vpop.f32.mrf.mxu3 }
 0x16a   :  { %v646_v7 = vadd.f32 %v621_v6, %v2130_v25  ;;  %v647_v19 = vadd.f32 %v641_v9, %v2132_v26  ;;  %v2186_v6 = vld [vmem:[#allocation8 + $0x1c8] sm:$0xff]  ;;  %v2208_v9 = vld [vmem:[#allocation8 + $0x180] sm:$0xff] }
 0x16b   :  { %1033 = vmatpush.msra.mxu1 %v2186_v6 }
 0x16c   :  { %v1478_v8 = vmul.f32 -1.442695, %v646_v7  ;;  %v2188_v7 = vld [vmem:[#allocation8 + $0x1d0] sm:$0xff] }
 0x16d   :  { %v1514_v21 = vpop.eup %1513  ;;  %1053 = vmatpush.msra.mxu2 %v2188_v7 }
 0x16e   :  { %v1516_v36 = vpop.eup %1515  ;;  %v651_v62 = vadd.f32 1.0, %v1514_v21  ;;  %1517 = vpow2.f32 %v1478_v8  ;;  %v2192_v8 = vld [vmem:[#allocation8 + $0x1d8] sm:$0xff]  ;;  %v2196_v21 = vld [vmem:[#allocation8 + $0x1a0] sm:$0xff] }
 0x16f   :  { %v670_v49 = vadd.f32 1.0, %v1516_v36  ;;  %1073 = vmatpush.msra.mxu3 %v2192_v8  ;;  %v2198_v36 = vld [vmem:[#allocation8 + $0x1a8] sm:$0xff] }
 0x170   :  { %1519 = vrcp.f32 %v651_v62  ;;  %v663_v25 = vand.u32 2147483648, %v651_v62  ;;  %v661_v23 = vand.u32 2147483647, %v651_v62  ;;  %vm657_vm0 = vweird.f32 %v651_v62  ;;  %1034 = vmatpush.msra.mxu1 %v2198_v36 }
 0x171   :  { %1521 = vrcp.f32 %v670_v49  ;;  %v682_v15 = vand.u32 2147483648, %v670_v49  ;;  %v680_v24 = vand.u32 2147483647, %v670_v49  ;;  %vm676_vm2 = vweird.f32 %v670_v49 }
 0x172   :  { %v664_v26 = vor.u32 1.1754944e-38, %v663_v25  ;;  %vm662_vm3 = vcmp.eq.f32.partialorder %v661_v23, 8.507059e+37  ;;  %v2234_v25 = vld [vmem:[#allocation8 + $0x148] sm:$0xff]  ;;  %v2244_v23 = vld [vmem:[#allocation8 + $0x120] sm:$0xff] }
 0x173   :  { %v683_v37 = vor.u32 1.1754944e-38, %v682_v15  ;;  %vm681_vm5 = vcmp.eq.f32.partialorder %v680_v24, 8.507059e+37  ;;  %v2246_v15 = vld [vmem:[#allocation8 + $0x128] sm:$0xff]  ;;  %v2252_v24 = vld [vmem:[#allocation8 + $0x138] sm:$0xff] }
 0x174   :  { %v1518_v10 = vpop.eup %1517 }
 0x175   :  { %v689_v18 = vadd.f32 1.0, %v1518_v10  ;;  %v2210_v10 = vld [vmem:[#allocation8 + $0x188] sm:$0xff] }
 0x176   :  { %v1520_v11 = vpop.eup %1519  ;;  %1035 = vmatpush.msra.mxu1 %v2210_v10 }
 0x177   :  { %v1522_v12 = vpop.eup %1521  ;;  %v653_v13 = vmul.f32 %v1520_v11, %v651_v62  ;;  %1523 = vrcp.f32 %v689_v18  ;;  %vm658_vm14 = vweird.f32 %v1520_v11  ;;  %v701_v58 = vand.u32 2147483648, %v689_v18  ;;  %v2200_v62 = vld [vmem:[#allocation8 + $0x1b0] sm:$0xff] }
 0x178   :  { %v672_v14 = vmul.f32 %v1522_v12, %v670_v49  ;;  %1525 = vtanh.f32 %v647_v19  ;;  %vm677_vm15 = vweird.f32 %v1522_v12  ;;  %vm659_vm1 = vmor %vm657_vm0, %vm658_vm14  ;;  %vm695_vm7 = vweird.f32 %v689_v18  ;;  %v2204_v49 = vld [vmem:[#allocation8 + $0x1b8] sm:$0xff]  ;;  %1054 = vmatpush.msra.mxu2 %v2200_v62  ;;  %v2220_v19 = vld [vmem:[#allocation8 + $0x160] sm:$0xff] }
 0x179   :  { %v654_v16 = vsub.f32 1.0, %v653_v13  ;;  %vm678_vm4 = vmor %vm676_vm2, %vm677_vm15  ;;  %v699_v59 = vand.u32 2147483647, %v689_v18  ;;  %v702_v61 = vor.u32 1.1754944e-38, %v701_v58  ;;  %1074 = vmatpush.msra.mxu3 %v2204_v49  ;;  %v2224_v13 = vld [vmem:[#allocation8 + $0x170] sm:$0xff]  ;;  %v2294_v58 = vld [vmem:[#allocation8 + $0xa0] sm:$0xff] }
 0x17a   :  { %v673_v17 = vsub.f32 1.0, %v672_v14  ;;  %v2228_v14 = vld [vmem:[#allocation8 + $0x178] sm:$0xff] }
 0x17b   :  { %v655_v20 = vmul.f32 %v1520_v11, %v654_v16  ;;  %vm700_vm9 = vcmp.eq.f32.partialorder %v699_v59, 8.507059e+37  ;;  %v2232_v16 = vld [vmem:[#allocation8 + $0x140] sm:$0xff]  ;;  %v2296_v59 = vld [vmem:[#allocation8 + $0xa8] sm:$0xff] }
 0x17c   :  { %v674_v22 = vmul.f32 %v1522_v12, %v673_v17  ;;  %v2236_v17 = vld [vmem:[#allocation8 + $0x150] sm:$0xff] }
 0x17d   :  { %v1524_v27 = vpop.eup %1523  ;;  %v656_v28 = vadd.f32 %v1520_v11, %v655_v20  ;;  %v2240_v20 = vld [vmem:[#allocation8 + $0x158] sm:$0xff] }
 0x17e   :  { %v691_v31 = vmul.f32 %v1524_v27, %v689_v18  ;;  %v675_v32 = vadd.f32 %v1522_v12, %v674_v22  ;;  %v1526_v40 = vpop.eup %1525  ;;  %vm696_vm6 = vweird.f32 %v1524_v27  ;;  %v2212_v18 = vld [vmem:[#allocation8 + $0x190] sm:$0xff] }
 0x17f   :  { %v660_v35 = vsel %vm659_vm1, %v1520_v11, %v656_v28  ;;  %vm697_vm8 = vmor %vm695_vm7, %vm696_vm6  ;;  %v2216_v11 = vld [vmem:[#allocation8 + $0x198] sm:$0xff]  ;;  %1055 = vmatpush.msra.mxu2 %v2212_v18  ;;  %v2248_v22 = vld [vmem:[#allocation8 + $0x130] sm:$0xff] }
 0x180   :  { %v692_v41 = vsub.f32 1.0, %v691_v31  ;;  %v665_v44 = vsel %vm662_vm3, %v664_v26, %v660_v35  ;;  %v679_v45 = vsel %vm678_vm4, %v1522_v12, %v675_v32  ;;  %1075 = vmatpush.msra.mxu3 %v2216_v11  ;;  %v2222_v12 = vld [vmem:[#allocation8 + $0x168] sm:$0xff]  ;;  %v2260_v26 = vld [vmem:[#allocation8 + $0x110] sm:$0xff]  ;;  %v2264_v31 = vld [vmem:[#allocation8 + $0x118] sm:$0xff] }
 0x181   :  { %v684_v48 = vsel %vm681_vm5, %v683_v37, %v679_v45  ;;  %v706_v50 = vmul.f32 %v665_v44, %v2161_v52  ;;  %v2172_v52 = vld [vmem:[#allocation8 + $0x1e0] sm:$0xff]  ;;  %1036 = vmatpush.msra.mxu1 %v2222_v12  ;;  %1056 = vmatpush.msra.mxu2 %v2224_v13  ;;  %v2258_v28 = vld [vmem:[#allocation8 + $0x108] sm:$0xff]  ;;  %v2272_v37 = vld [vmem:[#allocation8 + $0xf0] sm:$0xff] }
 0x182   :  { %v693_v51 = vmul.f32 %v1524_v27, %v692_v41  ;;  %v707_v55 = vmul.f32 %v1526_v40, %v684_v48  ;;  %1012 = vmatpush.msra.mxu0 %v2172_v52  ;;  %1076 = vmatpush.msra.mxu3 %v2228_v14  ;;  %v2268_v32 = vld [vmem:[#allocation8 + $0xe0] sm:$0xff]  ;;  %v2270_v35 = vld [vmem:[#allocation8 + $0xe8] sm:$0xff]  ;;  %v2276_v40 = vld [vmem:[#allocation8 + $0xf8] sm:$0xff] }
 0x183   :  { %1037 = vmatpush.msra.mxu1 %v2234_v25  ;;  %1057 = vmatpush.msra.mxu2 %v2236_v17  ;;  %v2280_v45 = vld [vmem:[#allocation8 + $0xc0] sm:$0xff]  ;;  %v2282_v48 = vld [vmem:[#allocation8 + $0xc8] sm:$0xff] }
 0x184   :  { %v2169_v56 = vadd.f32 %v707_v55, %v706_v50  ;;  %v694_v57 = vadd.f32 %v1524_v27, %v693_v51  ;;  %1013 = vmatpush.msra.mxu0 %v2184_v5  ;;  %1077 = vmatpush.msra.mxu3 %v2240_v20  ;;  %v2284_v50 = vld [vmem:[#allocation8 + $0xd0] sm:$0xff] }
 0x185   :  { %1038 = vmatpush.msra.mxu1 %v2246_v15  ;;  %1058 = vmatpush.msra.mxu2 %v2248_v22 }
 0x186   :  { %1527 = vtanh.f32 %v2169_v56  ;;  %v698_v60 = vsel %vm697_vm8, %v1524_v27, %v694_v57  ;;  %1014 = vmatpush.msra.mxu0 %v2196_v21  ;;  %1078 = vmatpush.msra.mxu3 %v2252_v24  ;;  %v2256_v27 = vld [vmem:[#allocation8 + $0x100] sm:$0xff]  ;;  %v2290_v57 = vld [vmem:[#allocation8 + $0xd8] sm:$0xff] }
 0x187   :  { %v703_v0 = vsel %vm700_vm9, %v702_v61, %v698_v60  ;;  %1039 = vmatpush.msra.mxu1 %v2258_v28  ;;  %1059 = vmatpush.msra.mxu2 %v2260_v26  ;;  %v2298_v60 = vld [vmem:[#allocation8 + $0xb0] sm:$0xff] }
 0x188   :  { %1015 = vmatpush.msra.mxu0 %v2208_v9  ;;  %1079 = vmatpush.msra.mxu3 %v2264_v31 }
 0x189   :  { %1040 = vmatpush.msra.mxu1 %v2270_v35  ;;  %1060 = vmatpush.msra.mxu2 %v2272_v37 }
 0x18a   :  { %1016 = vmatpush.msra.mxu0 %v2220_v19  ;;  %1080 = vmatpush.msra.mxu3 %v2276_v40 }
 0x18b   :  { %1041 = vmatpush.msra.mxu1 %v2282_v48  ;;  %1061 = vmatpush.msra.mxu2 %v2284_v50 }
 0x18c   :  { %v1528_v63 = vpop.eup %1527  ;;  %1017 = vmatpush.msra.mxu0 %v2232_v16  ;;  %1081 = vmatpush.msra.mxu3 %v2290_v57 }
 0x18d   :  { %v710_v1 = vmul.f32 %v1528_v63, %v703_v0  ;;  %1042 = vmatpush.msra.mxu1 %v2296_v59  ;;  %1062 = vmatpush.msra.mxu2 %v2298_v60  ;;  %v2306_v63 = vld [vmem:[#allocation8 + $0x80] sm:$0xff]  ;;  %v2308_v0 = vld [vmem:[#allocation8 + $0x88] sm:$0xff] }
 0x18e   :  { %1018 = vmatpush.msra.mxu0 %v2244_v23 }
 0x18f   :  { %804 = vmatmul.f32.vlgmr.msrb.gmra.mxu0 %v710_v1  ;;  %714 = vst [vmem:[#allocation10 + $0x8] sm:$0xff] %v710_v1  ;;  %824 = vmatmul.f32.vlgmr.msrb.gmra.mxu1 %v710_v1 }
 0x190   :  { %844 = vmatmul.f32.vlgmr.msrb.gmra.mxu2 %v710_v1  ;;  %864 = vmatmul.f32.vlgmr.msrb.gmra.mxu3 %v710_v1  ;;  %v2310_v1 = vld [vmem:[#allocation8 + $0x90] sm:$0xff] }
 0x191   :  { %1019 = vmatpush.msra.mxu0 %v2256_v27  ;;  %1043 = vmatpush.msra.mxu1 %v2308_v0 }
 0x192   :  { %1063 = vmatpush.msra.mxu2 %v2310_v1 }
 0x193   :  { %1020 = vmatpush.msra.mxu0 %v2268_v32 }
 0x195   :  { %1021 = vmatpush.msra.mxu0 %v2280_v45 }
 0x197   :  { %1022 = vmatpush.msra.mxu0 %v2294_v58 }
 0x199   :  { %1023 = vmatpush.msra.mxu0 %v2306_v63 }
 0x20c   :  { %v805_v41 = vpop.f32.mrf.mxu0  ;;  %v825_v44 = vpop.f32.mrf.mxu1 }
 0x20d   :  { %v868_v51 = vadd.f32 %v805_v41, %v2134_v29  ;;  %v869_v55 = vadd.f32 %v825_v44, %v2136_v30  ;;  %v2302_v30 = vld [vmem:[#allocation8 + $0xb8] sm:$0xff]  ;;  %v2316_v44 = vld [vmem:[#allocation8 + $0x60] sm:$0xff] }
 0x20e   :  { %1082 = vmatpush.msra.mxu3 %v2302_v30  ;;  %v2314_v41 = vld [vmem:[#allocation8 + $0x98] sm:$0xff]  ;;  %2523 = vst [vmem:[#allocation27_spill] sm:$0xff] %v2316_v44  ;;  %1024 = vmatpush.msra.mxu0 %v2316_v44 }
 0x20f   :  { %v1479_v61 = vmul.f32 -1.442695, %v868_v51  ;;  %v1480_v29 = vmul.f32 -1.442695, %v869_v55  ;;  %2522 = vst [vmem:[#allocation26_spill] sm:$0xff] %v2314_v41  ;;  %v2318_v51 = vld [vmem:[#allocation8 + $0x68] sm:$0xff] }
 0x210   :  { %2524 = vst [vmem:[#allocation28_spill] sm:$0xff] %v2318_v51  ;;  %1083 = vmatpush.msra.mxu3 %v2314_v41  ;;  %v2322_v55 = vld [vmem:[#allocation8 + $0x70] sm:$0xff]  ;;  %1044 = vmatpush.msra.mxu1 %v2318_v51  ;;  %v2347_v51 = vld [vmem:[#allocation8 + $0x38] sm:$0xff] }
 0x211   :  { %1529 = vpow2.f32 %v1479_v61  ;;  %2525 = vst [vmem:[#allocation29_spill] sm:$0xff] %v2322_v55  ;;  %v2326_v61 = vld [vmem:[#allocation8 + $0x40] sm:$0xff]  ;;  %1064 = vmatpush.msra.mxu2 %v2322_v55 }
 0x212   :  { %1531 = vpow2.f32 %v1480_v29  ;;  %2527 = vst [vmem:[#allocation31_spill] sm:$0xff] %v2326_v61  ;;  %v2334_v29 = vld [vmem:[#allocation8 + $0x58] sm:$0xff]  ;;  %1084 = vmatpush.msra.mxu3 %v2324_v54  ;;  %1025 = vmatpush.msra.mxu0 %v2326_v61  ;;  %v2357_v61 = vld [vmem:[#allocation8 + $0x10] sm:$0xff] }
 0x213   :  { %v845_v53 = vpop.f32.mrf.mxu2  ;;  %1045 = vmatpush.msra.mxu1 %v2330_v47  ;;  %1065 = vmatpush.msra.mxu2 %v2332_v46  ;;  %v2359_v47 = vld [vmem:[#allocation8 + $0x18] sm:$0xff] }
 0x214   :  { %v870_v43 = vadd.f32 %v845_v53, %v2138_v33  ;;  %1085 = vmatpush.msra.mxu3 %v2334_v29  ;;  %v2351_v33 = vld [vmem:[#allocation8] sm:$0xff]  ;;  %v2353_v53 = vld [vmem:[#allocation8 + $0x8] sm:$0xff]  ;;  %1026 = vmatpush.msra.mxu0 %v2339_v42 }
 0x215   :  { %1046 = vmatpush.msra.mxu1 %v2341_v39  ;;  %1066 = vmatpush.msra.mxu2 %v2345_v38 }
 0x216   :  { %v1481_v44 = vmul.f32 -1.442695, %v870_v43  ;;  %1086 = vmatpush.msra.mxu3 %v2347_v51  ;;  %1027 = vmatpush.msra.mxu0 %v2351_v33 }
 0x217   :  { %v1530_v54 = vpop.eup %1529  ;;  %1047 = vmatpush.msra.mxu1 %v2353_v53  ;;  %1067 = vmatpush.msra.mxu2 %v2357_v61 }
 0x218   :  { %v1532_v55 = vpop.eup %1531  ;;  %v2361_v41 = vadd.f32 1.0, %v1530_v54  ;;  %1533 = vpow2.f32 %v1481_v44  ;;  %1087 = vmatpush.msra.mxu3 %v2359_v47  ;;  %1236 = vmatpush.msrb.mxu0 %v2172_v52  ;;  %v865_v54 = vpop.f32.mrf.mxu3 }
 0x219   :  { %v2365_v43 = vadd.f32 1.0, %v1532_v55  ;;  %1256 = vmatpush.msrb.mxu1 %v2174_v2  ;;  %1276 = vmatpush.msrb.mxu2 %v2176_v3  ;;  %v871_v2 = vadd.f32 %v865_v54, %v2140_v34 }
 0x21a   :  { %1535 = vrcp.f32 %v2361_v41  ;;  %1296 = vmatpush.msrb.mxu3 %v2180_v4  ;;  %1237 = vmatpush.msrb.mxu0 %v2184_v5  ;;  %vm881_vm12 = vweird.f32 %v2361_v41 }
 0x21b   :  { %1537 = vrcp.f32 %v2365_v43  ;;  %1257 = vmatpush.msrb.mxu1 %v2186_v6  ;;  %1277 = vmatpush.msrb.mxu2 %v2188_v7  ;;  %v887_v6 = vand.u32 2147483648, %v2361_v41  ;;  %vm900_vm14 = vweird.f32 %v2365_v43 }
 0x21c   :  { %1297 = vmatpush.msrb.mxu3 %v2192_v8  ;;  %1238 = vmatpush.msrb.mxu0 %v2196_v21  ;;  %v885_v21 = vand.u32 2147483647, %v2361_v41 }
 0x21d   :  { %1258 = vmatpush.msrb.mxu1 %v2198_v36  ;;  %1278 = vmatpush.msrb.mxu2 %v2200_v62  ;;  %v906_v36 = vand.u32 2147483648, %v2365_v43 }
 0x21e   :  { %v1534_v44 = vpop.eup %1533  ;;  %1298 = vmatpush.msrb.mxu3 %v2204_v49  ;;  %1239 = vmatpush.msrb.mxu0 %v2208_v9  ;;  %v904_v49 = vand.u32 2147483647, %v2365_v43  ;;  %vm886_vm15 = vcmp.eq.f32.partialorder %v885_v21, 8.507059e+37 }
 0x21f   :  { %v2381_v55 = vadd.f32 1.0, %v1534_v44  ;;  %1259 = vmatpush.msrb.mxu1 %v2210_v10  ;;  %1279 = vmatpush.msrb.mxu2 %v2212_v18 }
 0x220   :  { %v1536_v52 = vpop.eup %1535  ;;  %1299 = vmatpush.msrb.mxu3 %v2216_v11  ;;  %1240 = vmatpush.msrb.mxu0 %v2220_v19  ;;  %v888_v11 = vor.u32 1.1754944e-38, %v887_v6  ;;  %vm905_vm1 = vcmp.eq.f32.partialorder %v904_v49, 8.507059e+37 }
 0x221   :  { %v1538_v3 = vpop.eup %1537  ;;  %v877_v4 = vmul.f32 %v1536_v52, %v2361_v41  ;;  %1539 = vrcp.f32 %v2381_v55  ;;  %1260 = vmatpush.msrb.mxu1 %v2222_v12  ;;  %1280 = vmatpush.msrb.mxu2 %v2224_v13  ;;  %vm882_vm10 = vweird.f32 %v1536_v52  ;;  %vm919_vm3 = vweird.f32 %v2381_v55 }
 0x222   :  { %v896_v5 = vmul.f32 %v1538_v3, %v2365_v43  ;;  %1541 = vtanh.f32 %v871_v2  ;;  %1300 = vmatpush.msrb.mxu3 %v2228_v14  ;;  %1241 = vmatpush.msrb.mxu0 %v2232_v16  ;;  %vm901_vm11 = vweird.f32 %v1538_v3  ;;  %vm2413_vm13 = vmor %vm881_vm12, %vm882_vm10  ;;  %v907_v14 = vor.u32 1.1754944e-38, %v906_v36  ;;  %v2541_v2 = vld [vmem:[#allocation21_spill] sm:$0xff] }
 0x223   :  { %v878_v34 = vsub.f32 1.0, %v877_v4  ;;  %1261 = vmatpush.msrb.mxu1 %v2234_v25  ;;  %1281 = vmatpush.msrb.mxu2 %v2236_v17  ;;  %vm902_vm0 = vmor %vm900_vm14, %vm901_vm11 }
 0x224   :  { %v897_v7 = vsub.f32 1.0, %v896_v5  ;;  %1301 = vmatpush.msrb.mxu3 %v2240_v20  ;;  %1242 = vmatpush.msrb.mxu0 %v2244_v23 }
 0x225   :  { %v879_v8 = vmul.f32 %v1536_v52, %v878_v34  ;;  %1262 = vmatpush.msrb.mxu1 %v2246_v15  ;;  %1282 = vmatpush.msrb.mxu2 %v2248_v22 }
 0x226   :  { %v898_v62 = vmul.f32 %v1538_v3, %v897_v7  ;;  %1302 = vmatpush.msrb.mxu3 %v2252_v24  ;;  %1243 = vmatpush.msrb.mxu0 %v2256_v27 }
 0x227   :  { %v2407_v9 = vpop.eup %1539  ;;  %v880_v10 = vadd.f32 %v1536_v52, %v879_v8  ;;  %1263 = vmatpush.msrb.mxu1 %v2258_v28  ;;  %1283 = vmatpush.msrb.mxu2 %v2260_v26  ;;  %v925_v28 = vand.u32 2147483648, %v2381_v55  ;;  %v923_v26 = vand.u32 2147483647, %v2381_v55 }
 0x228   :  { %v915_v19 = vmul.f32 %v2407_v9, %v2381_v55  ;;  %v899_v12 = vadd.f32 %v1538_v3, %v898_v62  ;;  %v1542_v16 = vpop.eup %1541  ;;  %1303 = vmatpush.msrb.mxu3 %v2264_v31  ;;  %1244 = vmatpush.msrb.mxu0 %v2268_v32  ;;  %vm920_vm2 = vweird.f32 %v2407_v9  ;;  %v2531_v31 = vld [vmem:[#allocation26_spill] sm:$0xff] }
 0x229   :  { %v884_v13 = vsel %vm2413_vm13, %v1536_v52, %v880_v10  ;;  %1264 = vmatpush.msrb.mxu1 %v2270_v35  ;;  %1284 = vmatpush.msrb.mxu2 %v2272_v37  ;;  %vm921_vm4 = vmor %vm919_vm3, %vm920_vm2  ;;  %v2532_v35 = vld [vmem:[#allocation27_spill] sm:$0xff]  ;;  %v2533_v37 = vld [vmem:[#allocation28_spill] sm:$0xff]  ;;  %vm924_vm5 = vcmp.eq.f32.partialorder %v923_v26, 8.507059e+37 }
 0x22a   :  { %v916_v25 = vsub.f32 1.0, %v915_v19  ;;  %v889_v17 = vsel %vm886_vm15, %v888_v11, %v884_v13  ;;  %v903_v20 = vsel %vm902_vm0, %v1538_v3, %v899_v12  ;;  %1304 = vmatpush.msrb.mxu3 %v2276_v40  ;;  %1245 = vmatpush.msrb.mxu0 %v2280_v45  ;;  %v926_v40 = vor.u32 1.1754944e-38, %v925_v28  ;;  %v2534_v45 = vld [vmem:[#allocation29_spill] sm:$0xff] }
 0x22b   :  { %v908_v23 = vsel %vm905_vm1, %v907_v14, %v903_v20  ;;  %v930_v15 = vmul.f32 %v889_v17, %v2169_v56  ;;  %1265 = vmatpush.msrb.mxu1 %v2282_v48  ;;  %1285 = vmatpush.msrb.mxu2 %v2284_v50  ;;  %v2535_v48 = vld [vmem:[#allocation30_spill] sm:$0xff]  ;;  %v2536_v50 = vld [vmem:[#allocation31_spill] sm:$0xff] }
 0x22c   :  { %v917_v22 = vmul.f32 %v2407_v9, %v916_v25  ;;  %v931_v24 = vmul.f32 %v1542_v16, %v908_v23  ;;  %1305 = vmatpush.msrb.mxu3 %v2290_v57  ;;  %1246 = vmatpush.msrb.mxu0 %v2294_v58  ;;  %v2537_v57 = vld [vmem:[#allocation32_spill] sm:$0xff] }
 0x22d   :  { %1266 = vmatpush.msrb.mxu1 %v2296_v59  ;;  %1286 = vmatpush.msrb.mxu2 %v2298_v60 }
 0x22e   :  { %v2437_v27 = vadd.f32 %v931_v24, %v930_v15  ;;  %v918_v56 = vadd.f32 %v2407_v9, %v917_v22  ;;  %1306 = vmatpush.msrb.mxu3 %v2302_v30  ;;  %1247 = vmatpush.msrb.mxu0 %v2306_v63 }
 0x22f   :  { %1267 = vmatpush.msrb.mxu1 %v2308_v0  ;;  %1287 = vmatpush.msrb.mxu2 %v2310_v1 }
 0x230   :  { %1543 = vtanh.f32 %v2437_v27  ;;  %1307 = vmatpush.msrb.mxu3 %v2531_v31  ;;  %v922_v32 = vsel %vm921_vm4, %v2407_v9, %v918_v56  ;;  %1248 = vmatpush.msrb.mxu0 %v2532_v35 }
 0x231   :  { %1268 = vmatpush.msrb.mxu1 %v2533_v37  ;;  %1288 = vmatpush.msrb.mxu2 %v2534_v45  ;;  %v927_v59 = vsel %vm924_vm5, %v926_v40, %v922_v32 }
 0x232   :  { %1308 = vmatpush.msrb.mxu3 %v2535_v48  ;;  %1249 = vmatpush.msrb.mxu0 %v2536_v50  ;;  %v2542_v50 = vld [vmem:[#allocation22_spill] sm:$0xff] }
 0x233   :  { %1269 = vmatpush.msrb.mxu1 %v2537_v57  ;;  %1289 = vmatpush.msrb.mxu2 %v2332_v46 }
 0x234   :  { %1309 = vmatpush.msrb.mxu3 %v2334_v29  ;;  %1250 = vmatpush.msrb.mxu0 %v2339_v42 }
 0x235   :  { %1270 = vmatpush.msrb.mxu1 %v2341_v39  ;;  %1290 = vmatpush.msrb.mxu2 %v2345_v38  ;;  %v2538_v39 = vld [vmem:[#allocation18_spill] sm:$0xff]  ;;  %v2539_v38 = vld [vmem:[#allocation19_spill] sm:$0xff] }
 0x236   :  { %v1544_v58 = vpop.eup %1543  ;;  %1310 = vmatpush.msrb.mxu3 %v2347_v51  ;;  %1251 = vmatpush.msrb.mxu0 %v2351_v33  ;;  %v2540_v51 = vld [vmem:[#allocation20_spill] sm:$0xff] }
 0x237   :  { %v934_v60 = vmul.f32 %v1544_v58, %v927_v59  ;;  %1271 = vmatpush.msrb.mxu1 %v2353_v53  ;;  %1291 = vmatpush.msrb.mxu2 %v2357_v61  ;;  %v2543_v58 = vld [vmem:[#allocation23_spill] sm:$0xff] }
 0x238   :  { %1311 = vmatpush.msrb.mxu3 %v2359_v47 }
 0x239   :  { %1028 = vmatmul.f32.vlgmr.msra.gmra.mxu0 %v934_v60  ;;  %938 = vst [vmem:[#allocation10 + $0x10] sm:$0xff] %v934_v60  ;;  %1048 = vmatmul.f32.vlgmr.msra.gmra.mxu1 %v934_v60 }
 0x23a   :  { %1068 = vmatmul.f32.vlgmr.msra.gmra.mxu2 %v934_v60  ;;  %1088 = vmatmul.f32.vlgmr.msra.gmra.mxu3 %v934_v60 }
 0x2b6   :  { %v1029_v42 = vpop.f32.mrf.mxu0  ;;  %v1049_v46 = vpop.f32.mrf.mxu1 }
 0x2b7   :  { %v1092_v30 = vadd.f32 %v1029_v42, %v2538_v39  ;;  %v1093_v63 = vadd.f32 %v1049_v46, %v2539_v38  ;;  %v2544_v39 = vld [vmem:[#allocation24_spill] sm:$0xff] }
 0x2b9   :  { %v1482_v0 = vmul.f32 -1.442695, %v1092_v30  ;;  %v1483_v1 = vmul.f32 -1.442695, %v1093_v63 }
 0x2bb   :  { %1545 = vpow2.f32 %v1482_v0 }
 0x2bc   :  { %1547 = vpow2.f32 %v1483_v1 }
 0x2bd   :  { %v1069_v41 = vpop.f32.mrf.mxu2  ;;  %v1089_v47 = vpop.f32.mrf.mxu3 }
 0x2be   :  { %v1094_v29 = vadd.f32 %v1069_v41, %v2540_v51  ;;  %v1095_v3 = vadd.f32 %v1089_v47, %v2541_v2 }
 0x2c0   :  { %v1484_v33 = vmul.f32 -1.442695, %v1094_v29 }
 0x2c1   :  { %v1546_v43 = vpop.eup %1545 }
 0x2c2   :  { %v1548_v53 = vpop.eup %1547  ;;  %v1099_v54 = vadd.f32 1.0, %v1546_v43  ;;  %1549 = vpow2.f32 %v1484_v33 }
 0x2c3   :  { %v1118_v61 = vadd.f32 1.0, %v1548_v53  ;;  %v2545_v53 = vld [vmem:[#allocation25_spill] sm:$0xff] }
 0x2c4   :  { %1551 = vrcp.f32 %v1099_v54  ;;  %v1111_v7 = vand.u32 2147483648, %v1099_v54  ;;  %v1109_v36 = vand.u32 2147483647, %v1099_v54  ;;  %vm1105_vm8 = vweird.f32 %v1099_v54 }
 0x2c5   :  { %1553 = vrcp.f32 %v1118_v61  ;;  %v1130_v62 = vand.u32 2147483648, %v1118_v61  ;;  %v1128_v9 = vand.u32 2147483647, %v1118_v61  ;;  %vm1124_vm10 = vweird.f32 %v1118_v61 }
 0x2c6   :  { %v1112_v11 = vor.u32 1.1754944e-38, %v1111_v7  ;;  %vm1110_vm11 = vcmp.eq.f32.partialorder %v1109_v36, 8.507059e+37 }
 0x2c7   :  { %v1131_v14 = vor.u32 1.1754944e-38, %v1130_v62  ;;  %vm1129_vm13 = vcmp.eq.f32.partialorder %v1128_v9, 8.507059e+37 }
 0x2c8   :  { %v1550_v44 = vpop.eup %1549 }
 0x2c9   :  { %v1137_v55 = vadd.f32 1.0, %v1550_v44 }
 0x2ca   :  { %v1552_v52 = vpop.eup %1551 }
 0x2cb   :  { %v1554_v4 = vpop.eup %1553  ;;  %v1101_v5 = vmul.f32 %v1552_v52, %v1099_v54  ;;  %1555 = vrcp.f32 %v1137_v55  ;;  %vm1106_vm6 = vweird.f32 %v1552_v52  ;;  %v1149_v26 = vand.u32 2147483648, %v1137_v55 }
 0x2cc   :  { %v1120_v34 = vmul.f32 %v1554_v4, %v1118_v61  ;;  %1557 = vtanh.f32 %v1095_v3  ;;  %vm1125_vm7 = vweird.f32 %v1554_v4  ;;  %vm1107_vm9 = vmor %vm1105_vm8, %vm1106_vm6  ;;  %vm1143_vm15 = vweird.f32 %v1137_v55 }
 0x2cd   :  { %v1102_v6 = vsub.f32 1.0, %v1101_v5  ;;  %vm1126_vm12 = vmor %vm1124_vm10, %vm1125_vm7  ;;  %v1147_v31 = vand.u32 2147483647, %v1137_v55  ;;  %v1150_v35 = vor.u32 1.1754944e-38, %v1149_v26 }
 0x2ce   :  { %v1121_v8 = vsub.f32 1.0, %v1120_v34 }
 0x2cf   :  { %v1103_v21 = vmul.f32 %v1552_v52, %v1102_v6  ;;  %vm1148_vm1 = vcmp.eq.f32.partialorder %v1147_v31, 8.507059e+37 }
 0x2d0   :  { %v1122_v49 = vmul.f32 %v1554_v4, %v1121_v8 }
 0x2d1   :  { %v1556_v10 = vpop.eup %1555  ;;  %v1104_v18 = vadd.f32 %v1552_v52, %v1103_v21 }
 0x2d2   :  { %v1139_v19 = vmul.f32 %v1556_v10, %v1137_v55  ;;  %v1123_v12 = vadd.f32 %v1554_v4, %v1122_v49  ;;  %v1558_v16 = vpop.eup %1557  ;;  %vm1144_vm14 = vweird.f32 %v1556_v10 }
 0x2d3   :  { %v1108_v13 = vsel %vm1107_vm9, %v1552_v52, %v1104_v18  ;;  %vm1145_vm0 = vmor %vm1143_vm15, %vm1144_vm14 }
 0x2d4   :  { %v1140_v25 = vsub.f32 1.0, %v1139_v19  ;;  %v1113_v17 = vsel %vm1110_vm11, %v1112_v11, %v1108_v13  ;;  %v1127_v20 = vsel %vm1126_vm12, %v1554_v4, %v1123_v12 }
 0x2d5   :  { %v1132_v23 = vsel %vm1129_vm13, %v1131_v14, %v1127_v20  ;;  %v1154_v15 = vmul.f32 %v1113_v17, %v2437_v27 }
 0x2d6   :  { %v1141_v22 = vmul.f32 %v1556_v10, %v1140_v25  ;;  %v1155_v24 = vmul.f32 %v1558_v16, %v1132_v23 }
 0x2d8   :  { %v2477_v56 = vadd.f32 %v1155_v24, %v1154_v15  ;;  %v1142_v28 = vadd.f32 %v1556_v10, %v1141_v22 }
 0x2da   :  { %1559 = vtanh.f32 %v2477_v56  ;;  %v1146_v32 = vsel %vm1145_vm0, %v1556_v10, %v1142_v28 }
 0x2db   :  { %v1151_v40 = vsel %vm1148_vm1, %v1150_v35, %v1146_v32 }
 0x2e0   :  { %v1560_v37 = vpop.eup %1559 }
 0x2e1   :  { %v1158_v45 = vmul.f32 %v1560_v37, %v1151_v40 }
 0x2e3   :  { %1252 = vmatmul.f32.vlgmr.msrb.gmra.mxu0 %v1158_v45  ;;  %1162 = vst [vmem:[#allocation10 + $0x18] sm:$0xff] %v1158_v45  ;;  %1272 = vmatmul.f32.vlgmr.msrb.gmra.mxu1 %v1158_v45 }
 0x2e4   :  { %1292 = vmatmul.f32.vlgmr.msrb.gmra.mxu2 %v1158_v45  ;;  %1312 = vmatmul.f32.vlgmr.msrb.gmra.mxu3 %v1158_v45 }
 0x360   :  { %v1253_v27 = vpop.f32.mrf.mxu0  ;;  %v1273_v48 = vpop.f32.mrf.mxu1 }
 0x361   :  { %v1316_v57 = vadd.f32 %v1253_v27, %v2542_v50  ;;  %v1317_v59 = vadd.f32 %v1273_v48, %v2543_v58 }
 0x363   :  { %v1485_v60 = vmul.f32 -1.442695, %v1316_v57  ;;  %v1486_v42 = vmul.f32 -1.442695, %v1317_v59 }
 0x365   :  { %1561 = vpow2.f32 %v1485_v60 }
 0x366   :  { %1563 = vpow2.f32 %v1486_v42 }
 0x367   :  { %v1293_v46 = vpop.f32.mrf.mxu2  ;;  %v1313_v51 = vpop.f32.mrf.mxu3 }
 0x368   :  { %v1318_v30 = vadd.f32 %v1293_v46, %v2544_v39  ;;  %v1319_v54 = vadd.f32 %v1313_v51, %v2545_v53 }
 0x36a   :  { %v1487_v38 = vmul.f32 -1.442695, %v1318_v30 }
 0x36b   :  { %v1562_v63 = vpop.eup %1561 }
 0x36c   :  { %v1564_v0 = vpop.eup %1563  ;;  %v1323_v1 = vadd.f32 1.0, %v1562_v63  ;;  %1565 = vpow2.f32 %v1487_v38 }
 0x36d   :  { %v1342_v41 = vadd.f32 1.0, %v1564_v0 }
 0x36e   :  { %1567 = vrcp.f32 %v1323_v1  ;;  %v1335_v52 = vand.u32 2147483648, %v1323_v1  ;;  %v1333_v4 = vand.u32 2147483647, %v1323_v1  ;;  %vm1329_vm4 = vweird.f32 %v1323_v1 }
 0x36f   :  { %1569 = vrcp.f32 %v1342_v41  ;;  %v1354_v5 = vand.u32 2147483648, %v1342_v41  ;;  %v1352_v6 = vand.u32 2147483647, %v1342_v41  ;;  %vm1348_vm6 = vweird.f32 %v1342_v41 }
 0x370   :  { %v1336_v21 = vor.u32 1.1754944e-38, %v1335_v52  ;;  %vm1334_vm7 = vcmp.eq.f32.partialorder %v1333_v4, 8.507059e+37 }
 0x371   :  { %v1355_v9 = vor.u32 1.1754944e-38, %v1354_v5  ;;  %vm1353_vm9 = vcmp.eq.f32.partialorder %v1352_v6, 8.507059e+37 }
 0x372   :  { %v1566_v29 = vpop.eup %1565 }
 0x373   :  { %v1361_v33 = vadd.f32 1.0, %v1566_v29 }
 0x374   :  { %v1568_v43 = vpop.eup %1567 }
 0x375   :  { %v1570_v61 = vpop.eup %1569  ;;  %v1325_v47 = vmul.f32 %v1568_v43, %v1323_v1  ;;  %1571 = vrcp.f32 %v1361_v33  ;;  %vm1330_vm2 = vweird.f32 %v1568_v43  ;;  %v1373_v20 = vand.u32 2147483648, %v1361_v33 }
 0x376   :  { %v1344_v44 = vmul.f32 %v1570_v61, %v1342_v41  ;;  %1573 = vtanh.f32 %v1319_v54  ;;  %vm1349_vm3 = vweird.f32 %v1570_v61  ;;  %vm1331_vm5 = vmor %vm1329_vm4, %vm1330_vm2  ;;  %vm1367_vm11 = vweird.f32 %v1361_v33 }
 0x377   :  { %v1326_v55 = vsub.f32 1.0, %v1325_v47  ;;  %vm1350_vm8 = vmor %vm1348_vm6, %vm1349_vm3  ;;  %v1371_v23 = vand.u32 2147483647, %v1361_v33  ;;  %v1374_v22 = vor.u32 1.1754944e-38, %v1373_v20 }
 0x378   :  { %v1345_v2 = vsub.f32 1.0, %v1344_v44 }
 0x379   :  { %v1327_v3 = vmul.f32 %v1568_v43, %v1326_v55  ;;  %vm1372_vm13 = vcmp.eq.f32.partialorder %v1371_v23, 8.507059e+37 }
 0x37a   :  { %v1346_v34 = vmul.f32 %v1570_v61, %v1345_v2 }
 0x37b   :  { %v1572_v7 = vpop.eup %1571  ;;  %v1328_v8 = vadd.f32 %v1568_v43, %v1327_v3 }
 0x37c   :  { %v1363_v36 = vmul.f32 %v1572_v7, %v1361_v33  ;;  %v1347_v62 = vadd.f32 %v1570_v61, %v1346_v34  ;;  %v1574_v10 = vpop.eup %1573  ;;  %vm1368_vm10 = vweird.f32 %v1572_v7 }
 0x37d   :  { %v1332_v49 = vsel %vm1331_vm5, %v1568_v43, %v1328_v8  ;;  %vm1369_vm12 = vmor %vm1367_vm11, %vm1368_vm10 }
 0x37e   :  { %v1364_v18 = vsub.f32 1.0, %v1363_v36  ;;  %v1337_v11 = vsel %vm1334_vm7, %v1336_v21, %v1332_v49  ;;  %v1351_v19 = vsel %vm1350_vm8, %v1570_v61, %v1347_v62 }
 0x37f   :  { %v1356_v12 = vsel %vm1353_vm9, %v1355_v9, %v1351_v19  ;;  %v1378_v13 = vmul.f32 %v1337_v11, %v2477_v56 }
 0x380   :  { %v1379_v14 = vmul.f32 %v1574_v10, %v1356_v12  ;;  %v1365_v16 = vmul.f32 %v1572_v7, %v1364_v18 }
 0x382   :  { %v1380_v25 = vadd.f32 %v1379_v14, %v1378_v13  ;;  %v1366_v17 = vadd.f32 %v1572_v7, %v1365_v16 }
 0x384   :  { %1575 = vtanh.f32 %v1380_v25  ;;  %1393 = vst [vmem:[#allocation13] sm:$0xff] %v1380_v25  ;;  %v1370_v15 = vsel %vm1369_vm12, %v1572_v7, %v1366_v17 }
 0x385   :  { %v1375_v56 = vsel %vm1372_vm13, %v1374_v22, %v1370_v15 }
 0x38a   :  { %v1576_v24 = vpop.eup %1575 }
 0x38b   :  { %v1382_v28 = vmul.f32 %v1576_v24, %v1375_v56 }
 0x38d   :  { %1386 = vst [vmem:[#allocation10 + $0x20] sm:$0xff] %v1382_v28 }
 0x38e   :  { %1391 = vst [vmem:[#allocation11] sm:$0xff] %v1382_v28  ;;  %1406 = dma.vmem_to_hbm [thread:$0]  %s1399_s28, 640, %s1401_s9, [#allocation7], %s1712_s6, %s1712_s6, %s1713_s7  }
 0x38f   :  { %1417 = dma.vmem_to_hbm [thread:$0]  %s1413_s11, 128, %s1415_s14, [#allocation12]  }
 0x390   :  { %1428 = dma.vmem_to_hbm [thread:$0]  %s1424_s16, 128, %s1426_s17, [#allocation12]  }
 0x391   :  { %1701 = dma.done.wait [#allocation7], 640  }
 0x392   :  { %1702 = vsyncadd [#allocation7], 4294966656 }
 0x393   :  { %1703 = dma.done.wait [#allocation12], 256  }
 0x394   :  { %1704 = vsyncadd [#allocation12], 4294967040 }
 0x395   :  { %1441 = vsyncpa [#allocation6], 1 }
 0x396   :  { %1442 = vsyncpa [#allocation9], 1 }
 0x397   :  { %1443 = vsyncpa [#allocation7], 1 }
 0x398   :  { %1444 = vsyncpa [#allocation12], 1 }

</bundles_post_ra>
